<compile_context>
chip_gen: v7x
topology: tpu7x:2x2x1
jax: 0.10.0
libtpu: 0.0.40
codegen_flags: <defaults>
</compile_context>

<pallas_src>
import functools

import jax
import jax.numpy as jnp
from jax import lax
from jax.experimental import pallas as pl
from jax.experimental.pallas import tpu as pltpu


# ---------------------------------------------------------------------------
# Fused kernel: LSTM recurrence + online masked attention + classifier.
# ---------------------------------------------------------------------------
def _fused_kernel(*refs, bin_label, has_x):
    if has_x:
        (inp_ref, lens_ref, x_ref, wih_ref, whh_ref, b_ref, vatt_ref,
         w1l_ref, w1x_ref, b1_ref, w2_ref, b2_ref, out_ref, gx_scr) = refs
    else:
        (inp_ref, lens_ref, wih_ref, whh_ref, b_ref, vatt_ref,
         w1l_ref, b1_ref, w2_ref, b2_ref, out_ref, gx_scr) = refs
        x_ref = w1x_ref = None

    T, B, F = inp_ref.shape
    Hl = whh_ref.shape[0]

    # ---- hoisted input projection: one big MXU matmul, bias folded in -----
    gx = (jnp.dot(inp_ref[...].reshape(T * B, F), wih_ref[...],
                  preferred_element_type=jnp.float32)
          + b_ref[...])                           # (T*B, 4H)
    gx_scr[...] = gx.reshape(T, B, 4 * Hl)

    lens = lens_ref[...]                          # (B, 1) int32, loaded once
    whh = whh_ref[...]                            # (Hl, 4Hl)
    v_row = vatt_ref[...]                         # (1, Hl) attention vector

    neg_big = jnp.float32(-1e30)
    h0 = jnp.zeros((B, Hl), jnp.float32)
    c0 = jnp.zeros((B, Hl), jnp.float32)
    m0 = jnp.full((B, 1), neg_big, jnp.float32)
    l0 = jnp.zeros((B, 1), jnp.float32)
    a0 = jnp.zeros((B, Hl), jnp.float32)

    def step(t, carry):
        h_prev, c_prev, m_prev, l_prev, acc_prev = carry
        gates = gx_scr[t] + jnp.dot(h_prev, whh,
                                    preferred_element_type=jnp.float32)
        # full-vreg transcendentals (4H == one 128-lane vreg), slice after
        sig_all = jax.nn.sigmoid(gates)
        tanh_all = jnp.tanh(gates)
        i = sig_all[:, 0 * Hl:1 * Hl]
        f = sig_all[:, 1 * Hl:2 * Hl]
        g = tanh_all[:, 2 * Hl:3 * Hl]
        o = sig_all[:, 3 * Hl:4 * Hl]
        c_new = f * c_prev + i * g
        h_new = o * jnp.tanh(c_new)

        # emulate pack_padded_sequence: freeze state past each sequence length
        valid = t < lens                          # (B, 1) bool
        c_nxt = jnp.where(valid, c_new, c_prev)
        h_nxt = jnp.where(valid, h_new, h_prev)

        # online (flash-style) masked attention over time
        score = jnp.sum(h_nxt * v_row, axis=-1, keepdims=True)   # (B,1)
        score = jnp.where(valid, score, neg_big)
        m_new = jnp.maximum(m_prev, score)
        scale = jnp.exp(m_prev - m_new)
        p = jnp.where(valid, jnp.exp(score - m_new), 0.0)
        l_new = scale * l_prev + p
        acc_new = scale * acc_prev + p * h_nxt
        return h_nxt, c_nxt, m_new, l_new, acc_new

    unroll = True if T <= 32 else 8
    _, _, _, l_f, acc_f = lax.fori_loop(0, T, step, (h0, c0, m0, l0, a0),
                                        unroll=unroll)

    # normalize (NaN-safe for seq_len == 0 rows); reciprocal goes to the EUP
    inv_l = pl.reciprocal(jnp.maximum(l_f, jnp.float32(1e-30)), approx=True)
    feat = acc_f * inv_l                          # (B, Hl)

    # ---- classifier epilogue (concat-free split matmul) --------------------
    h1 = (jnp.dot(feat, w1l_ref[...], preferred_element_type=jnp.float32)
          + b1_ref[...])
    if has_x:
        h1 = h1 + jnp.dot(x_ref[...], w1x_ref[...],
                          preferred_element_type=jnp.float32)
    h1 = jnp.maximum(h1, 0.0)
    logits = (jnp.dot(h1, w2_ref[...], preferred_element_type=jnp.float32)
              + b2_ref[...])
    if bin_label:
        logits = jax.nn.sigmoid(logits)
    out_ref[...] = logits.astype(out_ref.dtype)


# ---------------------------------------------------------------------------
# Wrapper (matches LstmAttentionEnsemble.forward)
# ---------------------------------------------------------------------------
def lstm_attention_ensemble_forward(params, x, inp_btf, seq_lens, *,
                                    bin_label=True):
    B, T, F = inp_btf.shape
    Hl = params["w_hh"].shape[0]
    w1, b1, w2, b2 = params["w1"], params["b1"], params["w2"], params["b2"]
    D_out = w2.shape[1]
    has_x = x is not None

    # pad batch to a sublane multiple of 8
    B_pad = ((B + 7) // 8) * 8
    pb = B_pad - B
    inp_p = jnp.pad(inp_btf.astype(jnp.float32), ((0, pb), (0, 0), (0, 0)))
    inp_tbf = jnp.transpose(inp_p, (1, 0, 2))                 # (T, B_pad, F)
    lens_p = jnp.pad(seq_lens.astype(jnp.int32), (0, pb)).reshape(B_pad, 1)

    # lane-dense output head: pad D_out up to a multiple of 128
    N_pad = ((D_out + 127) // 128) * 128
    w2_p = jnp.pad(w2, ((0, 0), (0, N_pad - D_out)))
    b2_p = jnp.pad(b2, ((0, 0), (0, N_pad - D_out)))

    v_row = params["v_att"].reshape(1, Hl)
    w1_lstm = w1[:Hl]                                         # (Hl, H_cls)

    args = [inp_tbf, lens_p]
    if has_x:
        d_x = x.shape[1]
        x_p = jnp.pad(x.astype(jnp.float32), ((0, pb), (0, 0)))
        w1_x = w1[Hl:Hl + d_x]                                # (D_X, H_cls)
        args.append(x_p)
    args += [params["w_ih"], params["w_hh"], params["b_lstm"], v_row, w1_lstm]
    if has_x:
        args.append(w1_x)
    args += [b1, w2_p, b2_p]

    kern = functools.partial(_fused_kernel, bin_label=bin_label, has_x=has_x)
    out = pl.pallas_call(
        kern,
        out_shape=jax.ShapeDtypeStruct((B_pad, N_pad), jnp.float32),
        in_specs=[pl.BlockSpec(memory_space=pltpu.MemorySpace.VMEM)
                  for _ in args],
        out_specs=pl.BlockSpec(memory_space=pltpu.MemorySpace.VMEM),
        scratch_shapes=[pltpu.VMEM((T, B_pad, 4 * Hl), jnp.float32)],
    )(*args)
    return out[:B, :D_out]


# ---------------------------------------------------------------------------
# Pure-JAX reference (mirrors the PyTorch module semantics) for verification.
# ---------------------------------------------------------------------------
def _reference_forward(params, x, inp_btf, seq_lens, *, bin_label=True):
    B, T, F = inp_btf.shape
    Hl = params["w_hh"].shape[0]
    h = jnp.zeros((B, Hl), jnp.float32)
    c = jnp.zeros((B, Hl), jnp.float32)
    hs = []
    for t in range(T):
        gates = (inp_btf[:, t] @ params["w_ih"] + h @ params["w_hh"]
                 + params["b_lstm"])
        i = jax.nn.sigmoid(gates[:, :Hl])
        f = jax.nn.sigmoid(gates[:, Hl:2 * Hl])
        g = jnp.tanh(gates[:, 2 * Hl:3 * Hl])
        o = jax.nn.sigmoid(gates[:, 3 * Hl:])
        c_new = f * c + i * g
        h_new = o * jnp.tanh(c_new)
        valid = (t < seq_lens)[:, None]
        c = jnp.where(valid, c_new, c)
        h = jnp.where(valid, h_new, h)
        hs.append(h)
    hs = jnp.stack(hs, axis=1)                                # (B, T, Hl)
    scores = hs @ params["v_att"]                             # (B, T, 1)
    mask = jnp.arange(T)[None, :, None] < seq_lens[:, None, None]
    scores = jnp.where(mask, scores, -1e30)
    alpha = jax.nn.softmax(scores, axis=1)
    out = jnp.sum(alpha * hs, axis=1)                         # (B, Hl)
    if x is not None:
        out = jnp.concatenate([out, x], axis=1)
    h1 = jnp.maximum(out @ params["w1"] + params["b1"], 0.0)
    logits = h1 @ params["w2"] + params["b2"]
    return jax.nn.sigmoid(logits) if bin_label else logits


if __name__ == "__main__":
    # Small shapes consistent with the module's forward.
    B, T, F = 2, 8, 16        # batch, seq len, LSTM input features
    H_LSTM = 32               # lstm_model output dim (4H = 128, lane aligned)
    D_X = 4                   # extra features concatenated (x)
    D_IN = H_LSTM + D_X       # classifier input dim
    H_CLS = 128               # classifier hidden dim (lane aligned)
    D_OUT = 1                 # classifier output dim
    BIN_LABEL = True          # append Sigmoid

    key = jax.random.PRNGKey(0)
    keys = jax.random.split(key, 10)

    params = {
        "w_ih": 0.1 * jax.random.normal(keys[0], (F, 4 * H_LSTM), jnp.float32),
        "w_hh": 0.1 * jax.random.normal(keys[1], (H_LSTM, 4 * H_LSTM), jnp.float32),
        "b_lstm": 0.1 * jax.random.normal(keys[2], (1, 4 * H_LSTM), jnp.float32),
        "v_att": 0.1 * jax.random.normal(keys[3], (H_LSTM, 1), jnp.float32),
        "w1": 0.1 * jax.random.normal(keys[4], (D_IN, H_CLS), jnp.float32),
        "b1": 0.1 * jax.random.normal(keys[5], (1, H_CLS), jnp.float32),
        "w2": 0.1 * jax.random.normal(keys[6], (H_CLS, D_OUT), jnp.float32),
        "b2": 0.1 * jax.random.normal(keys[7], (1, D_OUT), jnp.float32),
    }

    inp = jax.random.normal(keys[8], (B, T, F), jnp.float32)   # lstm input
    x = jax.random.normal(keys[9], (B, D_X), jnp.float32)      # extra features
    seq_lens = jnp.array([8, 5], dtype=jnp.int32)

    out = lstm_attention_ensemble_forward(params, x, inp, seq_lens,
                                          bin_label=BIN_LABEL)
    out = jax.block_until_ready(out)
    assert out.shape == (B, D_OUT)
    assert bool(jnp.all(jnp.isfinite(out)))

    ref = _reference_forward(params, x, inp, seq_lens, bin_label=BIN_LABEL)
    err = float(jnp.max(jnp.abs(out - ref)))
    assert err < 2e-2, f"mismatch vs reference: {err}"

    print("KERNEL_OK")
</pallas_src>

<mosaic_0001>
module attributes {stable_mosaic.version = 11 : i64} {
  func.func @_fused_kernel(%arg0: memref<8x8x16xf32, #tpu.memory_space<vmem>>, %arg1: memref<8x1xi32, #tpu.memory_space<vmem>>, %arg2: memref<8x4xf32, #tpu.memory_space<vmem>>, %arg3: memref<16x128xf32, #tpu.memory_space<vmem>>, %arg4: memref<32x128xf32, #tpu.memory_space<vmem>>, %arg5: memref<1x128xf32, #tpu.memory_space<vmem>>, %arg6: memref<1x32xf32, #tpu.memory_space<vmem>>, %arg7: memref<32x128xf32, #tpu.memory_space<vmem>>, %arg8: memref<4x128xf32, #tpu.memory_space<vmem>>, %arg9: memref<1x128xf32, #tpu.memory_space<vmem>>, %arg10: memref<128x128xf32, #tpu.memory_space<vmem>>, %arg11: memref<1x128xf32, #tpu.memory_space<vmem>>, %arg12: memref<8x128xf32, #tpu.memory_space<vmem>>, %arg13: memref<8x8x128xf32, #tpu.memory_space<vmem>>) attributes {dimension_semantics = [], scalar_prefetch = 0 : i64, scratch_operands = 1 : i64, tpu.core_type = #tpu.core_type<tc>} {
    %c0 = arith.constant 0 : index
    %c0_0 = arith.constant 0 : index
    %c0_1 = arith.constant 0 : index
    %0 = vector.load %arg0[%c0, %c0_0, %c0_1] : memref<8x8x16xf32, #tpu.memory_space<vmem>>, vector<8x8x16xf32>
    %1 = vector.shape_cast %0 : vector<8x8x16xf32> to vector<64x16xf32>
    %c0_2 = arith.constant 0 : index
    %c0_3 = arith.constant 0 : index
    %2 = vector.load %arg3[%c0_2, %c0_3] : memref<16x128xf32, #tpu.memory_space<vmem>>, vector<16x128xf32>
    %cst = arith.constant dense<0.000000e+00> : vector<64x128xf32>
    %3 = tpu.matmul %1, %2, %cst {dimension_numbers = #tpu.dot_dimension_numbers<[1], [0], [0], [1], [0, 0, 1, 1], [], []>} : vector<64x16xf32>, vector<16x128xf32>, vector<64x128xf32> -> vector<64x128xf32>
    %c0_4 = arith.constant 0 : index
    %c0_5 = arith.constant 0 : index
    %4 = vector.load %arg5[%c0_4, %c0_5] : memref<1x128xf32, #tpu.memory_space<vmem>>, vector<1x128xf32>
    %5 = vector.broadcast %4 : vector<1x128xf32> to vector<64x128xf32>
    %6 = arith.addf %3, %5 : vector<64x128xf32>
    %7 = vector.shape_cast %6 : vector<64x128xf32> to vector<8x8x128xf32>
    %c0_6 = arith.constant 0 : index
    %c0_7 = arith.constant 0 : index
    %c0_8 = arith.constant 0 : index
    %8 = vector.load %arg13[%c0_6, %c0_7, %c0_8] : memref<8x8x128xf32, #tpu.memory_space<vmem>>, vector<8x8x128xf32>
    tpu.vector_store %arg13[%c0_6, %c0_7, %c0_8], %7 {strides = array<i32>} : memref<8x8x128xf32, #tpu.memory_space<vmem>>, vector<8x8x128xf32>,
    %c0_9 = arith.constant 0 : index
    %c0_10 = arith.constant 0 : index
    %9 = vector.load %arg1[%c0_9, %c0_10] : memref<8x1xi32, #tpu.memory_space<vmem>>, vector<8x1xi32>
    %c0_11 = arith.constant 0 : index
    %c0_12 = arith.constant 0 : index
    %10 = vector.load %arg4[%c0_11, %c0_12] : memref<32x128xf32, #tpu.memory_space<vmem>>, vector<32x128xf32>
    %c0_13 = arith.constant 0 : index
    %c0_14 = arith.constant 0 : index
    %11 = vector.load %arg6[%c0_13, %c0_14] : memref<1x32xf32, #tpu.memory_space<vmem>>, vector<1x32xf32>
    %cst_15 = arith.constant 0.000000e+00 : f32
    %12 = vector.broadcast %cst_15 : f32 to vector<8x32xf32>
    %cst_16 = arith.constant 0.000000e+00 : f32
    %13 = vector.broadcast %cst_16 : f32 to vector<8x32xf32>
    %cst_17 = arith.constant -1.000000e+30 : f32
    %14 = vector.broadcast %cst_17 : f32 to vector<8x1xf32>
    %cst_18 = arith.constant 0.000000e+00 : f32
    %15 = vector.broadcast %cst_18 : f32 to vector<8x1xf32>
    %cst_19 = arith.constant 0.000000e+00 : f32
    %16 = vector.broadcast %cst_19 : f32 to vector<8x32xf32>
    %cst_20 = arith.constant -1.000000e+30 : f32
    %c0_i32 = arith.constant 0 : i32
    %17 = arith.index_cast %c0_i32 : i32 to index
    %c0_21 = arith.constant 0 : index
    %c0_22 = arith.constant 0 : index
    %18 = vector.load %arg13[%17, %c0_21, %c0_22] : memref<8x8x128xf32, #tpu.memory_space<vmem>>, vector<1x8x128xf32>
    %19 = vector.shape_cast %18 : vector<1x8x128xf32> to vector<8x128xf32>
    %cst_23 = arith.constant dense<0.000000e+00> : vector<8x128xf32>
    %20 = tpu.matmul %12, %10, %cst_23 {dimension_numbers = #tpu.dot_dimension_numbers<[1], [0], [0], [1], [0, 0, 1, 1], [], []>} : vector<8x32xf32>, vector<32x128xf32>, vector<8x128xf32> -> vector<8x128xf32>
    %21 = arith.addf %19, %20 : vector<8x128xf32>
    %22 = arith.negf %21 : vector<8x128xf32>
    %23 = math.exp %22 : vector<8x128xf32>
    %cst_24 = arith.constant 1.000000e+00 : f32
    %24 = vector.broadcast %cst_24 : f32 to vector<8x128xf32>
    %25 = arith.addf %24, %23 : vector<8x128xf32>
    %26 = arith.divf %24, %25 : vector<8x128xf32>
    %27 = math.tanh %21 : vector<8x128xf32>
    %28 = vector.extract_strided_slice %26 {offsets = [0, 0], sizes = [8, 32], strides = [1, 1]} : vector<8x128xf32> to vector<8x32xf32>
    %29 = vector.extract_strided_slice %26 {offsets = [0, 32], sizes = [8, 32], strides = [1, 1]} : vector<8x128xf32> to vector<8x32xf32>
    %30 = vector.extract_strided_slice %27 {offsets = [0, 64], sizes = [8, 32], strides = [1, 1]} : vector<8x128xf32> to vector<8x32xf32>
    %31 = vector.extract_strided_slice %26 {offsets = [0, 96], sizes = [8, 32], strides = [1, 1]} : vector<8x128xf32> to vector<8x32xf32>
    %32 = arith.mulf %29, %13 : vector<8x32xf32>
    %33 = arith.mulf %28, %30 : vector<8x32xf32>
    %34 = arith.addf %32, %33 : vector<8x32xf32>
    %35 = math.tanh %34 : vector<8x32xf32>
    %36 = arith.mulf %31, %35 : vector<8x32xf32>
    %37 = vector.broadcast %c0_i32 : i32 to vector<8x1xi32>
    %38 = arith.cmpi slt, %37, %9 : vector<8x1xi32>
    %39 = vector.shape_cast %38 : vector<8x1xi1> to vector<8x1xi1>
    %40 = vector.broadcast %39 : vector<8x1xi1> to vector<8x32xi1>
    %41 = arith.select %40, %34, %13 : vector<8x32xi1>, vector<8x32xf32>
    %42 = vector.shape_cast %38 : vector<8x1xi1> to vector<8x1xi1>
    %43 = vector.broadcast %42 : vector<8x1xi1> to vector<8x32xi1>
    %44 = arith.select %43, %36, %12 : vector<8x32xi1>, vector<8x32xf32>
    %45 = vector.broadcast %11 : vector<1x32xf32> to vector<8x32xf32>
    %46 = arith.mulf %44, %45 : vector<8x32xf32>
    %cst_25 = arith.constant dense<0.000000e+00> : vector<8xf32>
    %47 = vector.multi_reduction <add>, %46, %cst_25 [1] : vector<8x32xf32> to vector<8xf32>
    %48 = vector.shape_cast %47 : vector<8xf32> to vector<8x1xf32>
    %49 = vector.broadcast %cst_20 : f32 to vector<8x1xf32>
    %50 = arith.select %38, %48, %49 : vector<8x1xi1>, vector<8x1xf32>
    %51 = arith.maximumf %14, %50 : vector<8x1xf32>
    %52 = arith.subf %14, %51 : vector<8x1xf32>
    %53 = math.exp %52 : vector<8x1xf32>
    %54 = arith.subf %50, %51 : vector<8x1xf32>
    %55 = math.exp %54 : vector<8x1xf32>
    %cst_26 = arith.constant 0.000000e+00 : f32
    %56 = vector.broadcast %cst_26 : f32 to vector<8x1xf32>
    %57 = arith.select %38, %55, %56 : vector<8x1xi1>, vector<8x1xf32>
    %58 = arith.mulf %53, %15 : vector<8x1xf32>
    %59 = arith.addf %58, %57 : vector<8x1xf32>
    %60 = vector.broadcast %53 : vector<8x1xf32> to vector<8x32xf32>
    %61 = arith.mulf %60, %16 : vector<8x32xf32>
    %62 = vector.broadcast %57 : vector<8x1xf32> to vector<8x32xf32>
    %63 = arith.mulf %62, %44 : vector<8x32xf32>
    %64 = arith.addf %61, %63 : vector<8x32xf32>
    %c1_i32 = arith.constant 1 : i32
    %65 = arith.index_cast %c1_i32 : i32 to index
    %c0_27 = arith.constant 0 : index
    %c0_28 = arith.constant 0 : index
    %66 = vector.load %arg13[%65, %c0_27, %c0_28] : memref<8x8x128xf32, #tpu.memory_space<vmem>>, vector<1x8x128xf32>
    %67 = vector.shape_cast %66 : vector<1x8x128xf32> to vector<8x128xf32>
    %cst_29 = arith.constant dense<0.000000e+00> : vector<8x128xf32>
    %68 = tpu.matmul %44, %10, %cst_29 {dimension_numbers = #tpu.dot_dimension_numbers<[1], [0], [0], [1], [0, 0, 1, 1], [], []>} : vector<8x32xf32>, vector<32x128xf32>, vector<8x128xf32> -> vector<8x128xf32>
    %69 = arith.addf %67, %68 : vector<8x128xf32>
    %70 = arith.negf %69 : vector<8x128xf32>
    %71 = math.exp %70 : vector<8x128xf32>
    %cst_30 = arith.constant 1.000000e+00 : f32
    %72 = vector.broadcast %cst_30 : f32 to vector<8x128xf32>
    %73 = arith.addf %72, %71 : vector<8x128xf32>
    %74 = arith.divf %72, %73 : vector<8x128xf32>
    %75 = math.tanh %69 : vector<8x128xf32>
    %76 = vector.extract_strided_slice %74 {offsets = [0, 0], sizes = [8, 32], strides = [1, 1]} : vector<8x128xf32> to vector<8x32xf32>
    %77 = vector.extract_strided_slice %74 {offsets = [0, 32], sizes = [8, 32], strides = [1, 1]} : vector<8x128xf32> to vector<8x32xf32>
    %78 = vector.extract_strided_slice %75 {offsets = [0, 64], sizes = [8, 32], strides = [1, 1]} : vector<8x128xf32> to vector<8x32xf32>
    %79 = vector.extract_strided_slice %74 {offsets = [0, 96], sizes = [8, 32], strides = [1, 1]} : vector<8x128xf32> to vector<8x32xf32>
    %80 = arith.mulf %77, %41 : vector<8x32xf32>
    %81 = arith.mulf %76, %78 : vector<8x32xf32>
    %82 = arith.addf %80, %81 : vector<8x32xf32>
    %83 = math.tanh %82 : vector<8x32xf32>
    %84 = arith.mulf %79, %83 : vector<8x32xf32>
    %85 = vector.broadcast %c1_i32 : i32 to vector<8x1xi32>
    %86 = arith.cmpi slt, %85, %9 : vector<8x1xi32>
    %87 = vector.shape_cast %86 : vector<8x1xi1> to vector<8x1xi1>
    %88 = vector.broadcast %87 : vector<8x1xi1> to vector<8x32xi1>
    %89 = arith.select %88, %82, %41 : vector<8x32xi1>, vector<8x32xf32>
    %90 = vector.shape_cast %86 : vector<8x1xi1> to vector<8x1xi1>
    %91 = vector.broadcast %90 : vector<8x1xi1> to vector<8x32xi1>
    %92 = arith.select %91, %84, %44 : vector<8x32xi1>, vector<8x32xf32>
    %93 = vector.broadcast %11 : vector<1x32xf32> to vector<8x32xf32>
    %94 = arith.mulf %92, %93 : vector<8x32xf32>
    %cst_31 = arith.constant dense<0.000000e+00> : vector<8xf32>
    %95 = vector.multi_reduction <add>, %94, %cst_31 [1] : vector<8x32xf32> to vector<8xf32>
    %96 = vector.shape_cast %95 : vector<8xf32> to vector<8x1xf32>
    %97 = vector.broadcast %cst_20 : f32 to vector<8x1xf32>
    %98 = arith.select %86, %96, %97 : vector<8x1xi1>, vector<8x1xf32>
    %99 = arith.maximumf %51, %98 : vector<8x1xf32>
    %100 = arith.subf %51, %99 : vector<8x1xf32>
    %101 = math.exp %100 : vector<8x1xf32>
    %102 = arith.subf %98, %99 : vector<8x1xf32>
    %103 = math.exp %102 : vector<8x1xf32>
    %cst_32 = arith.constant 0.000000e+00 : f32
    %104 = vector.broadcast %cst_32 : f32 to vector<8x1xf32>
    %105 = arith.select %86, %103, %104 : vector<8x1xi1>, vector<8x1xf32>
    %106 = arith.mulf %101, %59 : vector<8x1xf32>
    %107 = arith.addf %106, %105 : vector<8x1xf32>
    %108 = vector.broadcast %101 : vector<8x1xf32> to vector<8x32xf32>
    %109 = arith.mulf %108, %64 : vector<8x32xf32>
    %110 = vector.broadcast %105 : vector<8x1xf32> to vector<8x32xf32>
    %111 = arith.mulf %110, %92 : vector<8x32xf32>
    %112 = arith.addf %109, %111 : vector<8x32xf32>
    %c2_i32 = arith.constant 2 : i32
    %113 = arith.index_cast %c2_i32 : i32 to index
    %c0_33 = arith.constant 0 : index
    %c0_34 = arith.constant 0 : index
    %114 = vector.load %arg13[%113, %c0_33, %c0_34] : memref<8x8x128xf32, #tpu.memory_space<vmem>>, vector<1x8x128xf32>
    %115 = vector.shape_cast %114 : vector<1x8x128xf32> to vector<8x128xf32>
    %cst_35 = arith.constant dense<0.000000e+00> : vector<8x128xf32>
    %116 = tpu.matmul %92, %10, %cst_35 {dimension_numbers = #tpu.dot_dimension_numbers<[1], [0], [0], [1], [0, 0, 1, 1], [], []>} : vector<8x32xf32>, vector<32x128xf32>, vector<8x128xf32> -> vector<8x128xf32>
    %117 = arith.addf %115, %116 : vector<8x128xf32>
    %118 = arith.negf %117 : vector<8x128xf32>
    %119 = math.exp %118 : vector<8x128xf32>
    %cst_36 = arith.constant 1.000000e+00 : f32
    %120 = vector.broadcast %cst_36 : f32 to vector<8x128xf32>
    %121 = arith.addf %120, %119 : vector<8x128xf32>
    %122 = arith.divf %120, %121 : vector<8x128xf32>
    %123 = math.tanh %117 : vector<8x128xf32>
    %124 = vector.extract_strided_slice %122 {offsets = [0, 0], sizes = [8, 32], strides = [1, 1]} : vector<8x128xf32> to vector<8x32xf32>
    %125 = vector.extract_strided_slice %122 {offsets = [0, 32], sizes = [8, 32], strides = [1, 1]} : vector<8x128xf32> to vector<8x32xf32>
    %126 = vector.extract_strided_slice %123 {offsets = [0, 64], sizes = [8, 32], strides = [1, 1]} : vector<8x128xf32> to vector<8x32xf32>
    %127 = vector.extract_strided_slice %122 {offsets = [0, 96], sizes = [8, 32], strides = [1, 1]} : vector<8x128xf32> to vector<8x32xf32>
    %128 = arith.mulf %125, %89 : vector<8x32xf32>
    %129 = arith.mulf %124, %126 : vector<8x32xf32>
    %130 = arith.addf %128, %129 : vector<8x32xf32>
    %131 = math.tanh %130 : vector<8x32xf32>
    %132 = arith.mulf %127, %131 : vector<8x32xf32>
    %133 = vector.broadcast %c2_i32 : i32 to vector<8x1xi32>
    %134 = arith.cmpi slt, %133, %9 : vector<8x1xi32>
    %135 = vector.shape_cast %134 : vector<8x1xi1> to vector<8x1xi1>
    %136 = vector.broadcast %135 : vector<8x1xi1> to vector<8x32xi1>
    %137 = arith.select %136, %130, %89 : vector<8x32xi1>, vector<8x32xf32>
    %138 = vector.shape_cast %134 : vector<8x1xi1> to vector<8x1xi1>
    %139 = vector.broadcast %138 : vector<8x1xi1> to vector<8x32xi1>
    %140 = arith.select %139, %132, %92 : vector<8x32xi1>, vector<8x32xf32>
    %141 = vector.broadcast %11 : vector<1x32xf32> to vector<8x32xf32>
    %142 = arith.mulf %140, %141 : vector<8x32xf32>
    %cst_37 = arith.constant dense<0.000000e+00> : vector<8xf32>
    %143 = vector.multi_reduction <add>, %142, %cst_37 [1] : vector<8x32xf32> to vector<8xf32>
    %144 = vector.shape_cast %143 : vector<8xf32> to vector<8x1xf32>
    %145 = vector.broadcast %cst_20 : f32 to vector<8x1xf32>
    %146 = arith.select %134, %144, %145 : vector<8x1xi1>, vector<8x1xf32>
    %147 = arith.maximumf %99, %146 : vector<8x1xf32>
    %148 = arith.subf %99, %147 : vector<8x1xf32>
    %149 = math.exp %148 : vector<8x1xf32>
    %150 = arith.subf %146, %147 : vector<8x1xf32>
    %151 = math.exp %150 : vector<8x1xf32>
    %cst_38 = arith.constant 0.000000e+00 : f32
    %152 = vector.broadcast %cst_38 : f32 to vector<8x1xf32>
    %153 = arith.select %134, %151, %152 : vector<8x1xi1>, vector<8x1xf32>
    %154 = arith.mulf %149, %107 : vector<8x1xf32>
    %155 = arith.addf %154, %153 : vector<8x1xf32>
    %156 = vector.broadcast %149 : vector<8x1xf32> to vector<8x32xf32>
    %157 = arith.mulf %156, %112 : vector<8x32xf32>
    %158 = vector.broadcast %153 : vector<8x1xf32> to vector<8x32xf32>
    %159 = arith.mulf %158, %140 : vector<8x32xf32>
    %160 = arith.addf %157, %159 : vector<8x32xf32>
    %c3_i32 = arith.constant 3 : i32
    %161 = arith.index_cast %c3_i32 : i32 to index
    %c0_39 = arith.constant 0 : index
    %c0_40 = arith.constant 0 : index
    %162 = vector.load %arg13[%161, %c0_39, %c0_40] : memref<8x8x128xf32, #tpu.memory_space<vmem>>, vector<1x8x128xf32>
    %163 = vector.shape_cast %162 : vector<1x8x128xf32> to vector<8x128xf32>
    %cst_41 = arith.constant dense<0.000000e+00> : vector<8x128xf32>
    %164 = tpu.matmul %140, %10, %cst_41 {dimension_numbers = #tpu.dot_dimension_numbers<[1], [0], [0], [1], [0, 0, 1, 1], [], []>} : vector<8x32xf32>, vector<32x128xf32>, vector<8x128xf32> -> vector<8x128xf32>
    %165 = arith.addf %163, %164 : vector<8x128xf32>
    %166 = arith.negf %165 : vector<8x128xf32>
    %167 = math.exp %166 : vector<8x128xf32>
    %cst_42 = arith.constant 1.000000e+00 : f32
    %168 = vector.broadcast %cst_42 : f32 to vector<8x128xf32>
    %169 = arith.addf %168, %167 : vector<8x128xf32>
    %170 = arith.divf %168, %169 : vector<8x128xf32>
    %171 = math.tanh %165 : vector<8x128xf32>
    %172 = vector.extract_strided_slice %170 {offsets = [0, 0], sizes = [8, 32], strides = [1, 1]} : vector<8x128xf32> to vector<8x32xf32>
    %173 = vector.extract_strided_slice %170 {offsets = [0, 32], sizes = [8, 32], strides = [1, 1]} : vector<8x128xf32> to vector<8x32xf32>
    %174 = vector.extract_strided_slice %171 {offsets = [0, 64], sizes = [8, 32], strides = [1, 1]} : vector<8x128xf32> to vector<8x32xf32>
    %175 = vector.extract_strided_slice %170 {offsets = [0, 96], sizes = [8, 32], strides = [1, 1]} : vector<8x128xf32> to vector<8x32xf32>
    %176 = arith.mulf %173, %137 : vector<8x32xf32>
    %177 = arith.mulf %172, %174 : vector<8x32xf32>
    %178 = arith.addf %176, %177 : vector<8x32xf32>
    %179 = math.tanh %178 : vector<8x32xf32>
    %180 = arith.mulf %175, %179 : vector<8x32xf32>
    %181 = vector.broadcast %c3_i32 : i32 to vector<8x1xi32>
    %182 = arith.cmpi slt, %181, %9 : vector<8x1xi32>
    %183 = vector.shape_cast %182 : vector<8x1xi1> to vector<8x1xi1>
    %184 = vector.broadcast %183 : vector<8x1xi1> to vector<8x32xi1>
    %185 = arith.select %184, %178, %137 : vector<8x32xi1>, vector<8x32xf32>
    %186 = vector.shape_cast %182 : vector<8x1xi1> to vector<8x1xi1>
    %187 = vector.broadcast %186 : vector<8x1xi1> to vector<8x32xi1>
    %188 = arith.select %187, %180, %140 : vector<8x32xi1>, vector<8x32xf32>
    %189 = vector.broadcast %11 : vector<1x32xf32> to vector<8x32xf32>
    %190 = arith.mulf %188, %189 : vector<8x32xf32>
    %cst_43 = arith.constant dense<0.000000e+00> : vector<8xf32>
    %191 = vector.multi_reduction <add>, %190, %cst_43 [1] : vector<8x32xf32> to vector<8xf32>
    %192 = vector.shape_cast %191 : vector<8xf32> to vector<8x1xf32>
    %193 = vector.broadcast %cst_20 : f32 to vector<8x1xf32>
    %194 = arith.select %182, %192, %193 : vector<8x1xi1>, vector<8x1xf32>
    %195 = arith.maximumf %147, %194 : vector<8x1xf32>
    %196 = arith.subf %147, %195 : vector<8x1xf32>
    %197 = math.exp %196 : vector<8x1xf32>
    %198 = arith.subf %194, %195 : vector<8x1xf32>
    %199 = math.exp %198 : vector<8x1xf32>
    %cst_44 = arith.constant 0.000000e+00 : f32
    %200 = vector.broadcast %cst_44 : f32 to vector<8x1xf32>
    %201 = arith.select %182, %199, %200 : vector<8x1xi1>, vector<8x1xf32>
    %202 = arith.mulf %197, %155 : vector<8x1xf32>
    %203 = arith.addf %202, %201 : vector<8x1xf32>
    %204 = vector.broadcast %197 : vector<8x1xf32> to vector<8x32xf32>
    %205 = arith.mulf %204, %160 : vector<8x32xf32>
    %206 = vector.broadcast %201 : vector<8x1xf32> to vector<8x32xf32>
    %207 = arith.mulf %206, %188 : vector<8x32xf32>
    %208 = arith.addf %205, %207 : vector<8x32xf32>
    %c4_i32 = arith.constant 4 : i32
    %209 = arith.index_cast %c4_i32 : i32 to index
    %c0_45 = arith.constant 0 : index
    %c0_46 = arith.constant 0 : index
    %210 = vector.load %arg13[%209, %c0_45, %c0_46] : memref<8x8x128xf32, #tpu.memory_space<vmem>>, vector<1x8x128xf32>
    %211 = vector.shape_cast %210 : vector<1x8x128xf32> to vector<8x128xf32>
    %cst_47 = arith.constant dense<0.000000e+00> : vector<8x128xf32>
    %212 = tpu.matmul %188, %10, %cst_47 {dimension_numbers = #tpu.dot_dimension_numbers<[1], [0], [0], [1], [0, 0, 1, 1], [], []>} : vector<8x32xf32>, vector<32x128xf32>, vector<8x128xf32> -> vector<8x128xf32>
    %213 = arith.addf %211, %212 : vector<8x128xf32>
    %214 = arith.negf %213 : vector<8x128xf32>
    %215 = math.exp %214 : vector<8x128xf32>
    %cst_48 = arith.constant 1.000000e+00 : f32
    %216 = vector.broadcast %cst_48 : f32 to vector<8x128xf32>
    %217 = arith.addf %216, %215 : vector<8x128xf32>
    %218 = arith.divf %216, %217 : vector<8x128xf32>
    %219 = math.tanh %213 : vector<8x128xf32>
    %220 = vector.extract_strided_slice %218 {offsets = [0, 0], sizes = [8, 32], strides = [1, 1]} : vector<8x128xf32> to vector<8x32xf32>
    %221 = vector.extract_strided_slice %218 {offsets = [0, 32], sizes = [8, 32], strides = [1, 1]} : vector<8x128xf32> to vector<8x32xf32>
    %222 = vector.extract_strided_slice %219 {offsets = [0, 64], sizes = [8, 32], strides = [1, 1]} : vector<8x128xf32> to vector<8x32xf32>
    %223 = vector.extract_strided_slice %218 {offsets = [0, 96], sizes = [8, 32], strides = [1, 1]} : vector<8x128xf32> to vector<8x32xf32>
    %224 = arith.mulf %221, %185 : vector<8x32xf32>
    %225 = arith.mulf %220, %222 : vector<8x32xf32>
    %226 = arith.addf %224, %225 : vector<8x32xf32>
    %227 = math.tanh %226 : vector<8x32xf32>
    %228 = arith.mulf %223, %227 : vector<8x32xf32>
    %229 = vector.broadcast %c4_i32 : i32 to vector<8x1xi32>
    %230 = arith.cmpi slt, %229, %9 : vector<8x1xi32>
    %231 = vector.shape_cast %230 : vector<8x1xi1> to vector<8x1xi1>
    %232 = vector.broadcast %231 : vector<8x1xi1> to vector<8x32xi1>
    %233 = arith.select %232, %226, %185 : vector<8x32xi1>, vector<8x32xf32>
    %234 = vector.shape_cast %230 : vector<8x1xi1> to vector<8x1xi1>
    %235 = vector.broadcast %234 : vector<8x1xi1> to vector<8x32xi1>
    %236 = arith.select %235, %228, %188 : vector<8x32xi1>, vector<8x32xf32>
    %237 = vector.broadcast %11 : vector<1x32xf32> to vector<8x32xf32>
    %238 = arith.mulf %236, %237 : vector<8x32xf32>
    %cst_49 = arith.constant dense<0.000000e+00> : vector<8xf32>
    %239 = vector.multi_reduction <add>, %238, %cst_49 [1] : vector<8x32xf32> to vector<8xf32>
    %240 = vector.shape_cast %239 : vector<8xf32> to vector<8x1xf32>
    %241 = vector.broadcast %cst_20 : f32 to vector<8x1xf32>
    %242 = arith.select %230, %240, %241 : vector<8x1xi1>, vector<8x1xf32>
    %243 = arith.maximumf %195, %242 : vector<8x1xf32>
    %244 = arith.subf %195, %243 : vector<8x1xf32>
    %245 = math.exp %244 : vector<8x1xf32>
    %246 = arith.subf %242, %243 : vector<8x1xf32>
    %247 = math.exp %246 : vector<8x1xf32>
    %cst_50 = arith.constant 0.000000e+00 : f32
    %248 = vector.broadcast %cst_50 : f32 to vector<8x1xf32>
    %249 = arith.select %230, %247, %248 : vector<8x1xi1>, vector<8x1xf32>
    %250 = arith.mulf %245, %203 : vector<8x1xf32>
    %251 = arith.addf %250, %249 : vector<8x1xf32>
    %252 = vector.broadcast %245 : vector<8x1xf32> to vector<8x32xf32>
    %253 = arith.mulf %252, %208 : vector<8x32xf32>
    %254 = vector.broadcast %249 : vector<8x1xf32> to vector<8x32xf32>
    %255 = arith.mulf %254, %236 : vector<8x32xf32>
    %256 = arith.addf %253, %255 : vector<8x32xf32>
    %c5_i32 = arith.constant 5 : i32
    %257 = arith.index_cast %c5_i32 : i32 to index
    %c0_51 = arith.constant 0 : index
    %c0_52 = arith.constant 0 : index
    %258 = vector.load %arg13[%257, %c0_51, %c0_52] : memref<8x8x128xf32, #tpu.memory_space<vmem>>, vector<1x8x128xf32>
    %259 = vector.shape_cast %258 : vector<1x8x128xf32> to vector<8x128xf32>
    %cst_53 = arith.constant dense<0.000000e+00> : vector<8x128xf32>
    %260 = tpu.matmul %236, %10, %cst_53 {dimension_numbers = #tpu.dot_dimension_numbers<[1], [0], [0], [1], [0, 0, 1, 1], [], []>} : vector<8x32xf32>, vector<32x128xf32>, vector<8x128xf32> -> vector<8x128xf32>
    %261 = arith.addf %259, %260 : vector<8x128xf32>
    %262 = arith.negf %261 : vector<8x128xf32>
    %263 = math.exp %262 : vector<8x128xf32>
    %cst_54 = arith.constant 1.000000e+00 : f32
    %264 = vector.broadcast %cst_54 : f32 to vector<8x128xf32>
    %265 = arith.addf %264, %263 : vector<8x128xf32>
    %266 = arith.divf %264, %265 : vector<8x128xf32>
    %267 = math.tanh %261 : vector<8x128xf32>
    %268 = vector.extract_strided_slice %266 {offsets = [0, 0], sizes = [8, 32], strides = [1, 1]} : vector<8x128xf32> to vector<8x32xf32>
    %269 = vector.extract_strided_slice %266 {offsets = [0, 32], sizes = [8, 32], strides = [1, 1]} : vector<8x128xf32> to vector<8x32xf32>
    %270 = vector.extract_strided_slice %267 {offsets = [0, 64], sizes = [8, 32], strides = [1, 1]} : vector<8x128xf32> to vector<8x32xf32>
    %271 = vector.extract_strided_slice %266 {offsets = [0, 96], sizes = [8, 32], strides = [1, 1]} : vector<8x128xf32> to vector<8x32xf32>
    %272 = arith.mulf %269, %233 : vector<8x32xf32>
    %273 = arith.mulf %268, %270 : vector<8x32xf32>
    %274 = arith.addf %272, %273 : vector<8x32xf32>
    %275 = math.tanh %274 : vector<8x32xf32>
    %276 = arith.mulf %271, %275 : vector<8x32xf32>
    %277 = vector.broadcast %c5_i32 : i32 to vector<8x1xi32>
    %278 = arith.cmpi slt, %277, %9 : vector<8x1xi32>
    %279 = vector.shape_cast %278 : vector<8x1xi1> to vector<8x1xi1>
    %280 = vector.broadcast %279 : vector<8x1xi1> to vector<8x32xi1>
    %281 = arith.select %280, %274, %233 : vector<8x32xi1>, vector<8x32xf32>
    %282 = vector.shape_cast %278 : vector<8x1xi1> to vector<8x1xi1>
    %283 = vector.broadcast %282 : vector<8x1xi1> to vector<8x32xi1>
    %284 = arith.select %283, %276, %236 : vector<8x32xi1>, vector<8x32xf32>
    %285 = vector.broadcast %11 : vector<1x32xf32> to vector<8x32xf32>
    %286 = arith.mulf %284, %285 : vector<8x32xf32>
    %cst_55 = arith.constant dense<0.000000e+00> : vector<8xf32>
    %287 = vector.multi_reduction <add>, %286, %cst_55 [1] : vector<8x32xf32> to vector<8xf32>
    %288 = vector.shape_cast %287 : vector<8xf32> to vector<8x1xf32>
    %289 = vector.broadcast %cst_20 : f32 to vector<8x1xf32>
    %290 = arith.select %278, %288, %289 : vector<8x1xi1>, vector<8x1xf32>
    %291 = arith.maximumf %243, %290 : vector<8x1xf32>
    %292 = arith.subf %243, %291 : vector<8x1xf32>
    %293 = math.exp %292 : vector<8x1xf32>
    %294 = arith.subf %290, %291 : vector<8x1xf32>
    %295 = math.exp %294 : vector<8x1xf32>
    %cst_56 = arith.constant 0.000000e+00 : f32
    %296 = vector.broadcast %cst_56 : f32 to vector<8x1xf32>
    %297 = arith.select %278, %295, %296 : vector<8x1xi1>, vector<8x1xf32>
    %298 = arith.mulf %293, %251 : vector<8x1xf32>
    %299 = arith.addf %298, %297 : vector<8x1xf32>
    %300 = vector.broadcast %293 : vector<8x1xf32> to vector<8x32xf32>
    %301 = arith.mulf %300, %256 : vector<8x32xf32>
    %302 = vector.broadcast %297 : vector<8x1xf32> to vector<8x32xf32>
    %303 = arith.mulf %302, %284 : vector<8x32xf32>
    %304 = arith.addf %301, %303 : vector<8x32xf32>
    %c6_i32 = arith.constant 6 : i32
    %305 = arith.index_cast %c6_i32 : i32 to index
    %c0_57 = arith.constant 0 : index
    %c0_58 = arith.constant 0 : index
    %306 = vector.load %arg13[%305, %c0_57, %c0_58] : memref<8x8x128xf32, #tpu.memory_space<vmem>>, vector<1x8x128xf32>
    %307 = vector.shape_cast %306 : vector<1x8x128xf32> to vector<8x128xf32>
    %cst_59 = arith.constant dense<0.000000e+00> : vector<8x128xf32>
    %308 = tpu.matmul %284, %10, %cst_59 {dimension_numbers = #tpu.dot_dimension_numbers<[1], [0], [0], [1], [0, 0, 1, 1], [], []>} : vector<8x32xf32>, vector<32x128xf32>, vector<8x128xf32> -> vector<8x128xf32>
    %309 = arith.addf %307, %308 : vector<8x128xf32>
    %310 = arith.negf %309 : vector<8x128xf32>
    %311 = math.exp %310 : vector<8x128xf32>
    %cst_60 = arith.constant 1.000000e+00 : f32
    %312 = vector.broadcast %cst_60 : f32 to vector<8x128xf32>
    %313 = arith.addf %312, %311 : vector<8x128xf32>
    %314 = arith.divf %312, %313 : vector<8x128xf32>
    %315 = math.tanh %309 : vector<8x128xf32>
    %316 = vector.extract_strided_slice %314 {offsets = [0, 0], sizes = [8, 32], strides = [1, 1]} : vector<8x128xf32> to vector<8x32xf32>
    %317 = vector.extract_strided_slice %314 {offsets = [0, 32], sizes = [8, 32], strides = [1, 1]} : vector<8x128xf32> to vector<8x32xf32>
    %318 = vector.extract_strided_slice %315 {offsets = [0, 64], sizes = [8, 32], strides = [1, 1]} : vector<8x128xf32> to vector<8x32xf32>
    %319 = vector.extract_strided_slice %314 {offsets = [0, 96], sizes = [8, 32], strides = [1, 1]} : vector<8x128xf32> to vector<8x32xf32>
    %320 = arith.mulf %317, %281 : vector<8x32xf32>
    %321 = arith.mulf %316, %318 : vector<8x32xf32>
    %322 = arith.addf %320, %321 : vector<8x32xf32>
    %323 = math.tanh %322 : vector<8x32xf32>
    %324 = arith.mulf %319, %323 : vector<8x32xf32>
    %325 = vector.broadcast %c6_i32 : i32 to vector<8x1xi32>
    %326 = arith.cmpi slt, %325, %9 : vector<8x1xi32>
    %327 = vector.shape_cast %326 : vector<8x1xi1> to vector<8x1xi1>
    %328 = vector.broadcast %327 : vector<8x1xi1> to vector<8x32xi1>
    %329 = arith.select %328, %322, %281 : vector<8x32xi1>, vector<8x32xf32>
    %330 = vector.shape_cast %326 : vector<8x1xi1> to vector<8x1xi1>
    %331 = vector.broadcast %330 : vector<8x1xi1> to vector<8x32xi1>
    %332 = arith.select %331, %324, %284 : vector<8x32xi1>, vector<8x32xf32>
    %333 = vector.broadcast %11 : vector<1x32xf32> to vector<8x32xf32>
    %334 = arith.mulf %332, %333 : vector<8x32xf32>
    %cst_61 = arith.constant dense<0.000000e+00> : vector<8xf32>
    %335 = vector.multi_reduction <add>, %334, %cst_61 [1] : vector<8x32xf32> to vector<8xf32>
    %336 = vector.shape_cast %335 : vector<8xf32> to vector<8x1xf32>
    %337 = vector.broadcast %cst_20 : f32 to vector<8x1xf32>
    %338 = arith.select %326, %336, %337 : vector<8x1xi1>, vector<8x1xf32>
    %339 = arith.maximumf %291, %338 : vector<8x1xf32>
    %340 = arith.subf %291, %339 : vector<8x1xf32>
    %341 = math.exp %340 : vector<8x1xf32>
    %342 = arith.subf %338, %339 : vector<8x1xf32>
    %343 = math.exp %342 : vector<8x1xf32>
    %cst_62 = arith.constant 0.000000e+00 : f32
    %344 = vector.broadcast %cst_62 : f32 to vector<8x1xf32>
    %345 = arith.select %326, %343, %344 : vector<8x1xi1>, vector<8x1xf32>
    %346 = arith.mulf %341, %299 : vector<8x1xf32>
    %347 = arith.addf %346, %345 : vector<8x1xf32>
    %348 = vector.broadcast %341 : vector<8x1xf32> to vector<8x32xf32>
    %349 = arith.mulf %348, %304 : vector<8x32xf32>
    %350 = vector.broadcast %345 : vector<8x1xf32> to vector<8x32xf32>
    %351 = arith.mulf %350, %332 : vector<8x32xf32>
    %352 = arith.addf %349, %351 : vector<8x32xf32>
    %c7_i32 = arith.constant 7 : i32
    %353 = arith.index_cast %c7_i32 : i32 to index
    %c0_63 = arith.constant 0 : index
    %c0_64 = arith.constant 0 : index
    %354 = vector.load %arg13[%353, %c0_63, %c0_64] : memref<8x8x128xf32, #tpu.memory_space<vmem>>, vector<1x8x128xf32>
    %355 = vector.shape_cast %354 : vector<1x8x128xf32> to vector<8x128xf32>
    %cst_65 = arith.constant dense<0.000000e+00> : vector<8x128xf32>
    %356 = tpu.matmul %332, %10, %cst_65 {dimension_numbers = #tpu.dot_dimension_numbers<[1], [0], [0], [1], [0, 0, 1, 1], [], []>} : vector<8x32xf32>, vector<32x128xf32>, vector<8x128xf32> -> vector<8x128xf32>
    %357 = arith.addf %355, %356 : vector<8x128xf32>
    %358 = arith.negf %357 : vector<8x128xf32>
    %359 = math.exp %358 : vector<8x128xf32>
    %cst_66 = arith.constant 1.000000e+00 : f32
    %360 = vector.broadcast %cst_66 : f32 to vector<8x128xf32>
    %361 = arith.addf %360, %359 : vector<8x128xf32>
    %362 = arith.divf %360, %361 : vector<8x128xf32>
    %363 = math.tanh %357 : vector<8x128xf32>
    %364 = vector.extract_strided_slice %362 {offsets = [0, 0], sizes = [8, 32], strides = [1, 1]} : vector<8x128xf32> to vector<8x32xf32>
    %365 = vector.extract_strided_slice %362 {offsets = [0, 32], sizes = [8, 32], strides = [1, 1]} : vector<8x128xf32> to vector<8x32xf32>
    %366 = vector.extract_strided_slice %363 {offsets = [0, 64], sizes = [8, 32], strides = [1, 1]} : vector<8x128xf32> to vector<8x32xf32>
    %367 = vector.extract_strided_slice %362 {offsets = [0, 96], sizes = [8, 32], strides = [1, 1]} : vector<8x128xf32> to vector<8x32xf32>
    %368 = arith.mulf %365, %329 : vector<8x32xf32>
    %369 = arith.mulf %364, %366 : vector<8x32xf32>
    %370 = arith.addf %368, %369 : vector<8x32xf32>
    %371 = math.tanh %370 : vector<8x32xf32>
    %372 = arith.mulf %367, %371 : vector<8x32xf32>
    %373 = vector.broadcast %c7_i32 : i32 to vector<8x1xi32>
    %374 = arith.cmpi slt, %373, %9 : vector<8x1xi32>
    %375 = vector.shape_cast %374 : vector<8x1xi1> to vector<8x1xi1>
    %376 = vector.broadcast %375 : vector<8x1xi1> to vector<8x32xi1>
    %377 = arith.select %376, %370, %329 : vector<8x32xi1>, vector<8x32xf32>
    %378 = vector.shape_cast %374 : vector<8x1xi1> to vector<8x1xi1>
    %379 = vector.broadcast %378 : vector<8x1xi1> to vector<8x32xi1>
    %380 = arith.select %379, %372, %332 : vector<8x32xi1>, vector<8x32xf32>
    %381 = vector.broadcast %11 : vector<1x32xf32> to vector<8x32xf32>
    %382 = arith.mulf %380, %381 : vector<8x32xf32>
    %cst_67 = arith.constant dense<0.000000e+00> : vector<8xf32>
    %383 = vector.multi_reduction <add>, %382, %cst_67 [1] : vector<8x32xf32> to vector<8xf32>
    %384 = vector.shape_cast %383 : vector<8xf32> to vector<8x1xf32>
    %385 = vector.broadcast %cst_20 : f32 to vector<8x1xf32>
    %386 = arith.select %374, %384, %385 : vector<8x1xi1>, vector<8x1xf32>
    %387 = arith.maximumf %339, %386 : vector<8x1xf32>
    %388 = arith.subf %339, %387 : vector<8x1xf32>
    %389 = math.exp %388 : vector<8x1xf32>
    %390 = arith.subf %386, %387 : vector<8x1xf32>
    %391 = math.exp %390 : vector<8x1xf32>
    %cst_68 = arith.constant 0.000000e+00 : f32
    %392 = vector.broadcast %cst_68 : f32 to vector<8x1xf32>
    %393 = arith.select %374, %391, %392 : vector<8x1xi1>, vector<8x1xf32>
    %394 = arith.mulf %389, %347 : vector<8x1xf32>
    %395 = arith.addf %394, %393 : vector<8x1xf32>
    %396 = vector.broadcast %389 : vector<8x1xf32> to vector<8x32xf32>
    %397 = arith.mulf %396, %352 : vector<8x32xf32>
    %398 = vector.broadcast %393 : vector<8x1xf32> to vector<8x32xf32>
    %399 = arith.mulf %398, %380 : vector<8x32xf32>
    %400 = arith.addf %397, %399 : vector<8x32xf32>
    %c8_i32 = arith.constant 8 : i32
    %cst_69 = arith.constant 1.000000e-30 : f32
    %401 = vector.broadcast %cst_69 : f32 to vector<8x1xf32>
    %402 = arith.maximumf %395, %401 : vector<8x1xf32>
    %403 = tpu.reciprocal %402 {approx = true} : vector<8x1xf32> -> vector<8x1xf32>
    %404 = vector.broadcast %403 : vector<8x1xf32> to vector<8x32xf32>
    %405 = arith.mulf %400, %404 : vector<8x32xf32>
    %c0_70 = arith.constant 0 : index
    %c0_71 = arith.constant 0 : index
    %406 = vector.load %arg7[%c0_70, %c0_71] : memref<32x128xf32, #tpu.memory_space<vmem>>, vector<32x128xf32>
    %cst_72 = arith.constant dense<0.000000e+00> : vector<8x128xf32>
    %407 = tpu.matmul %405, %406, %cst_72 {dimension_numbers = #tpu.dot_dimension_numbers<[1], [0], [0], [1], [0, 0, 1, 1], [], []>} : vector<8x32xf32>, vector<32x128xf32>, vector<8x128xf32> -> vector<8x128xf32>
    %c0_73 = arith.constant 0 : index
    %c0_74 = arith.constant 0 : index
    %408 = vector.load %arg9[%c0_73, %c0_74] : memref<1x128xf32, #tpu.memory_space<vmem>>, vector<1x128xf32>
    %409 = vector.broadcast %408 : vector<1x128xf32> to vector<8x128xf32>
    %410 = arith.addf %407, %409 : vector<8x128xf32>
    %c0_75 = arith.constant 0 : index
    %c0_76 = arith.constant 0 : index
    %411 = vector.load %arg2[%c0_75, %c0_76] : memref<8x4xf32, #tpu.memory_space<vmem>>, vector<8x4xf32>
    %c0_77 = arith.constant 0 : index
    %c0_78 = arith.constant 0 : index
    %412 = vector.load %arg8[%c0_77, %c0_78] : memref<4x128xf32, #tpu.memory_space<vmem>>, vector<4x128xf32>
    %cst_79 = arith.constant dense<0.000000e+00> : vector<8x128xf32>
    %413 = tpu.matmul %411, %412, %cst_79 {dimension_numbers = #tpu.dot_dimension_numbers<[1], [0], [0], [1], [0, 0, 1, 1], [], []>} : vector<8x4xf32>, vector<4x128xf32>, vector<8x128xf32> -> vector<8x128xf32>
    %414 = arith.addf %410, %413 : vector<8x128xf32>
    %cst_80 = arith.constant 0.000000e+00 : f32
    %415 = vector.broadcast %cst_80 : f32 to vector<8x128xf32>
    %416 = arith.maximumf %414, %415 : vector<8x128xf32>
    %c0_81 = arith.constant 0 : index
    %c0_82 = arith.constant 0 : index
    %417 = vector.load %arg10[%c0_81, %c0_82] : memref<128x128xf32, #tpu.memory_space<vmem>>, vector<128x128xf32>
    %cst_83 = arith.constant dense<0.000000e+00> : vector<8x128xf32>
    %418 = tpu.matmul %416, %417, %cst_83 {dimension_numbers = #tpu.dot_dimension_numbers<[1], [0], [0], [1], [0, 0, 1, 1], [], []>} : vector<8x128xf32>, vector<128x128xf32>, vector<8x128xf32> -> vector<8x128xf32>
    %c0_84 = arith.constant 0 : index
    %c0_85 = arith.constant 0 : index
    %419 = vector.load %arg11[%c0_84, %c0_85] : memref<1x128xf32, #tpu.memory_space<vmem>>, vector<1x128xf32>
    %420 = vector.broadcast %419 : vector<1x128xf32> to vector<8x128xf32>
    %421 = arith.addf %418, %420 : vector<8x128xf32>
    %422 = arith.negf %421 : vector<8x128xf32>
    %423 = math.exp %422 : vector<8x128xf32>
    %cst_86 = arith.constant 1.000000e+00 : f32
    %424 = vector.broadcast %cst_86 : f32 to vector<8x128xf32>
    %425 = arith.addf %424, %423 : vector<8x128xf32>
    %426 = arith.divf %424, %425 : vector<8x128xf32>
    %c0_87 = arith.constant 0 : index
    %c0_88 = arith.constant 0 : index
    %427 = vector.load %arg12[%c0_87, %c0_88] : memref<8x128xf32, #tpu.memory_space<vmem>>, vector<8x128xf32>
    tpu.vector_store %arg12[%c0_87, %c0_88], %426 {strides = array<i32>} : memref<8x128xf32, #tpu.memory_space<vmem>>, vector<8x128xf32>,
    return
  }
}

</mosaic_0001>

<bundles_post_ra>
// kernel: tpu_custom_call.1
= control target key start
LH: loop header
LB: loop body
LE: loop exit
PB: predicated region body
PF: predicated region fallthrough
CT: control target
= control target key end

     0   :  { %17 = vsyncpa [#allocation4], 0  ;;  %s2757_s0 = inlined_call_operand.hbm [shape: f32[8,8,16], index: 0, kind: input, shape index: {}]   ;;  %s2758_s1 = inlined_call_operand.vmem [shape: s32[8,1], index: 1, kind: input, shape index: {}]   ;;  %s2759_s2 = inlined_call_operand.vmem [shape: f32[8,4], index: 2, kind: input, shape index: {}]   ;;  %s2760_s3 = inlined_call_operand.hbm [shape: f32[16,128], index: 3, kind: input, shape index: {}]   ;;  %s2761_s4 = inlined_call_operand.vmem [shape: f32[32,128], index: 4, kind: input, shape index: {}]   ;;  %s2762_s5 = inlined_call_operand.vmem [shape: f32[1,128], index: 5, kind: input, shape index: {}]   ;;  %s2763_s6 = inlined_call_operand.vmem [shape: f32[1,32], index: 6, kind: input, shape index: {}]   ;;  %s2764_s7 = inlined_call_operand.hbm [shape: f32[32,128], index: 7, kind: input, shape index: {}]   ;;  %s2765_s8 = inlined_call_operand.vmem [shape: f32[4,128], index: 8, kind: input, shape index: {}]   ;;  %s2766_s9 = inlined_call_operand.vmem [shape: f32[1,128], index: 9, kind: input, shape index: {}]   ;;  %s2767_s10 = inlined_call_operand.hbm [shape: f32[128,128], index: 10, kind: input, shape index: {}]   ;;  %s2768_s11 = inlined_call_operand.vmem [shape: f32[1,128], index: 11, kind: input, shape index: {}]   ;;  %s2769_s12 = inlined_call_operand.hbm [shape: f32[8,128], index: 12, kind: output, shape index: {}]  }
   0x1   :  { %18 = vsyncpa [#allocation7], 0 }
   0x2   :  { %19 = vsyncpa [#allocation10], 0 }
   0x3   :  { %20 = vsyncpa [#allocation5], 0  ;;  %s2273_s21 = smov [#allocation6]   ;;  %s2274_s23 = smov [#allocation3]  }
   0x4   :  { %s42_s22 = sshll.u32 %s2273_s21, 4  ;;  %s26_s24 = sshll.u32 %s2274_s23, 4  ;;  %s43_s22 = int_to_ptr.vmem [resolvable:$true] %s42_s22  ;;  %s2352_s24 = int_to_ptr.vmem [resolvable:$true] %s26_s24 }
   0x5   :  { %s2155_s27 = scalar_lea.hbm %s2760_s3, 256 }
   0x6   :  { %p2156_p0 = scmp.ne.s32.totalorder %s2760_s3, %s2155_s27  ;;  %p2159_p1 = scmp.lt.u32.totalorder %s2155_s27, %s2760_s3 }
   0x8   :  { %p2161_p2 = pnand %p2159_p1, %p2156_p0 }
   0xa   :  { %2164 = shalt.err (!%p2161_p2)
}
   0xb   :  { %s2165_s14 = scalar_lea.vmem %s43_s22, 256  ;;  %p2170_p4 = scmp.lt.s32.totalorder %s43_s22, %s43_s22 }
   0xc   :  { %p2166_p3 = scmp.ne.s32.totalorder %s43_s22, %s2165_s14  ;;  %p2171_p5 = scmp.lt.s32.totalorder %s2165_s14, %s2165_s14 }
   0xe   :  { %p2172_p6 = por %p2171_p5, %p2170_p4 }
  0x10   :  { %p2173_p7 = pnand %p2172_p6, %p2166_p3 }
  0x12   :  { %2176 = shalt.err (!%p2173_p7)
}
  0x13   :  { %s2275_s15 = smov 128   ;;  %s2276_s16 = smov 8  }
  0x14   :  { %48 = dma.hbm_to_vmem [thread:$0]  %s2760_s3, 256, %s43_s22, [#allocation7], %s2275_s15, %s2275_s15, %s2276_s16  }
  0x15   :  { %s2177_s21 = scalar_lea.hbm %s2757_s0, 1024 }
  0x16   :  { %p2178_p8 = scmp.ne.s32.totalorder %s2757_s0, %s2177_s21  ;;  %p2181_p9 = scmp.lt.u32.totalorder %s2177_s21, %s2757_s0 }
  0x18   :  { %p2183_p10 = pnand %p2181_p9, %p2178_p8 }
  0x1a   :  { %2186 = shalt.err (!%p2183_p10)
}
  0x1b   :  { %s2187_s28 = scalar_lea.vmem %s2352_s24, 1024  ;;  %p2192_p12 = scmp.lt.s32.totalorder %s2352_s24, %s2352_s24 }
  0x1c   :  { %p2188_p11 = scmp.ne.s32.totalorder %s2352_s24, %s2187_s28  ;;  %p2193_p13 = scmp.lt.s32.totalorder %s2187_s28, %s2187_s28 }
  0x1e   :  { %p2194_p0 = por %p2193_p13, %p2192_p12 }
  0x20   :  { %p2195_p1 = pnand %p2194_p0, %p2188_p11 }
  0x22   :  { %2198 = shalt.err (!%p2195_p1)
}
  0x23   :  { %32 = dma.hbm_to_vmem [thread:$0]  %s2757_s0, 1024, %s2352_s24, [#allocation4], %s2275_s15, %s2275_s15, %s2276_s16  }
  0x24   :  { %s2277_s29 = smov [#allocation8]   ;;  %s2278_s13 = smov [#allocation9]  }
  0x25   :  { %s60_s30 = sshll.u32 %s2277_s29, 4  ;;  %s76_s14 = sshll.u32 %s2278_s13, 4  ;;  %s61_s30 = int_to_ptr.vmem [resolvable:$true] %s60_s30  ;;  %s2389_s14 = int_to_ptr.vmem [resolvable:$true] %s76_s14 }
  0x26   :  { %s2199_s19 = scalar_lea.hbm %s2764_s7, 512 }
  0x27   :  { %p2200_p2 = scmp.ne.s32.totalorder %s2764_s7, %s2199_s19  ;;  %p2203_p3 = scmp.lt.u32.totalorder %s2199_s19, %s2764_s7 }
  0x29   :  { %p2205_p4 = pnand %p2203_p3, %p2200_p2 }
  0x2b   :  { %2208 = shalt.err (!%p2205_p4)
}
  0x2c   :  { %s2209_s0 = scalar_lea.vmem %s61_s30, 512  ;;  %p2214_p6 = scmp.lt.s32.totalorder %s61_s30, %s61_s30 }
  0x2d   :  { %p2210_p5 = scmp.ne.s32.totalorder %s61_s30, %s2209_s0  ;;  %p2215_p7 = scmp.lt.s32.totalorder %s2209_s0, %s2209_s0 }
  0x2f   :  { %p2216_p8 = por %p2215_p7, %p2214_p6 }
  0x31   :  { %p2217_p9 = pnand %p2216_p8, %p2210_p5 }
  0x33   :  { %2220 = shalt.err (!%p2217_p9)
}
  0x34   :  { %66 = dma.hbm_to_vmem [thread:$0]  %s2764_s7, 512, %s61_s30, [#allocation7], %s2275_s15, %s2275_s15, %s2276_s16  }
  0x35   :  { %s2221_s3 = scalar_lea.hbm %s2767_s10, 2048 }
  0x36   :  { %p2222_p10 = scmp.ne.s32.totalorder %s2767_s10, %s2221_s3  ;;  %p2225_p11 = scmp.lt.u32.totalorder %s2221_s3, %s2767_s10 }
  0x38   :  { %p2227_p12 = pnand %p2225_p11, %p2222_p10 }
  0x3a   :  { %2230 = shalt.err (!%p2227_p12)
}
  0x3b   :  { %s2231_s18 = scalar_lea.vmem %s2389_s14, 2048  ;;  %p2236_p0 = scmp.lt.s32.totalorder %s2389_s14, %s2389_s14 }
  0x3c   :  { %p2232_p13 = scmp.ne.s32.totalorder %s2389_s14, %s2231_s18  ;;  %p2237_p1 = scmp.lt.s32.totalorder %s2231_s18, %s2231_s18 }
  0x3e   :  { %p2238_p2 = por %p2237_p1, %p2236_p0 }
  0x40   :  { %p2239_p3 = pnand %p2238_p2, %p2232_p13 }
  0x42   :  { %2242 = shalt.err (!%p2239_p3)
}
  0x43   :  { %82 = dma.hbm_to_vmem [thread:$0]  %s2767_s10, 2048, %s2389_s14, [#allocation10], %s2275_s15, %s2275_s15, %s2276_s16  }
  0x44   :  { %2265 = dma.done.wait [#allocation4], 1024  }
  0x45   :  { %2266 = vsyncadd [#allocation4], 4294966272 }
  0x46   :  { %2267 = dma.done.wait [#allocation7], 768  }
  0x47   :  { %2268 = vsyncadd [#allocation7], 4294966528 }
  0x48   :  { %2269 = dma.done.wait [#allocation10], 2048  }
  0x49   :  { %2270 = vsyncadd [#allocation10], 4294965248  ;;  %v2279_v0 = vmov 0.0|0.0   ;;  %vm2280_vm0 = vmmov 0   ;;  %v2281_v1 = vmov 0.0   ;;  %vm114_vm1 = vcmask 130048  }
  0x4a   :  { %1962 = vmatprep.subr.bf16.mxu1 %v2279_v0  ;;  %1832 = vmatprep.mubr.msk.f32.mxu1 %vm2280_vm0, %v2281_v1  ;;  %v105_v2 = vld [vmem:[#allocation6] sm:$0xff]  ;;  %v106_v3 = vld [vmem:[#allocation6 + $0x8] sm:$0xff]  ;;  %v255_v10 = vld [vmem:[%s2761_s4 + $0x10] sm:$0xff]  ;;  %v2282_v20 = vmov 0   ;;  %vm259_vm4 = vcmask 261120   ;;  %s2285_s28 = smov 96  }
  0x4b   :  { %v97_v4 = vld [vmem:[#allocation3] sm:$0xff]  ;;  %v1952_v5 = vpack.c.bf16 %v106_v3, %v105_v2  ;;  %v254_v7 = vld [vmem:[%s2761_s4 + $0x8] sm:$0xff]  ;;  %v256_v11 = vld [vmem:[%s2761_s4 + $0x18] sm:$0xff]  ;;  %2051 = vset.pattern.permute.xlu1 %v2282_v20  ;;  %2052 = vset.pattern.permute.xlu0 %v2282_v20 }
  0x4c   :  { %1801 = vmatprep.mubr.msk.f32.mxu0 %vm114_vm1, %v97_v4  ;;  %v253_v6 = vld [vmem:[%s2761_s4] sm:$0xff]  ;;  %v98_v9 = vld [vmem:[#allocation3 + $0x8] sm:$0xff]  ;;  %v99_v12 = vld [vmem:[#allocation3 + $0x10] sm:$0xff]  ;;  %v2448_v13 = vpack.c.bf16 %v256_v11, %v255_v10 }
  0x4d   :  { %v2436_v8 = vpack.c.bf16 %v254_v7, %v253_v6  ;;  %1953 = vmatprep.subr.bf16.mxu0 %v1952_v5  ;;  %v100_v14 = vld [vmem:[#allocation3 + $0x18] sm:$0xff]  ;;  %v101_v15 = vld [vmem:[#allocation3 + $0x20] sm:$0xff]  ;;  %v102_v16 = vld [vmem:[#allocation3 + $0x28] sm:$0xff] }
  0x4e   :  { %1955 = vmatpush3.bf16.msra.mxu0 %v1952_v5  ;;  %v103_v17 = vld [vmem:[#allocation3 + $0x30] sm:$0xff]  ;;  %v104_v18 = vld [vmem:[#allocation3 + $0x38] sm:$0xff]  ;;  %v2474_v19 = vld [vmem:[%s2758_s1] sm:$0xff]  ;;  %s2283_s1 = smov 64  }
  0x4f   :  { %1964 = vmatpush3.bf16.msra.mxu1 %v2436_v8  ;;  %1956 = vmatprep.subr.bf16.mxu0 %v2279_v0  ;;  %vm358_vm2 = vcmp.gt.s32.totalorder %v2474_v19, 0  ;;  %v1692_v22 = vld [vmem:[%s2762_s5] ss:$0 sm:$0xff]  ;;  %s2284_s5 = smov 32   ;;  %vm508_vm5 = vcmp.gt.s32.totalorder %v2474_v19, 1  ;;  %vm650_vm7 = vcmp.gt.s32.totalorder %v2474_v19, 2 }
  0x50   :  { %1965 = vmatprep.subr.bf16.mxu1 %v2279_v0  ;;  %v359_v21 = vsel %vm358_vm2, 1, %v2282_v20  ;;  %v509_v62 = vsel %vm508_vm5, 1, %v2282_v20  ;;  %vm792_vm9 = vcmp.gt.s32.totalorder %v2474_v19, 3  ;;  %vm934_vm11 = vcmp.gt.s32.totalorder %v2474_v19, 4 }
  0x51   :  { %1802 = vmatmul.mubr.msk.f32.vlgmr.msra.gmra.mrb[0].mxu0 %vm114_vm1, %v98_v9  ;;  %361 = vperm.xlu1 %2051, %v359_v21   ;;  %vm1076_vm13 = vcmp.gt.s32.totalorder %v2474_v19, 5  ;;  %vm1218_vm15 = vcmp.gt.s32.totalorder %v2474_v19, 6 }
  0x52   :  { %1958 = vmatpush3.bf16.msra.mxu0 %v2436_v8  ;;  %1804 = vmatprep.mubr.msk.f32.mxu0 %vm114_vm1, %v99_v12 }
  0x53   :  { %1959 = vmatprep.subr.bf16.mxu0 %v2279_v0  ;;  %1967 = vmatpush3.bf16.msra.mxu1 %v2448_v13 }
  0x54   :  { %1974 = vmatprep.subr.bf16.mxu1 %v2279_v0 }
  0x55   :  { %1805 = vmatmul.mubr.msk.f32.gmra.mrb[2].mxu0 %vm114_vm1, %v100_v14 }
  0x56   :  { %1807 = vmatprep.mubr.msk.f32.mxu0 %vm114_vm1, %v101_v15  ;;  %1961 = vmatpush3.bf16.msra.mxu0 %v2448_v13 }
  0x57   :  { %1968 = vmatprep.subr.bf16.mxu0 %v2279_v0 }
  0x59   :  { %1808 = vmatmul.mubr.msk.f32.gmra.mrb[4].mxu0 %vm114_vm1, %v102_v16 }
  0x5a   :  { %1810 = vmatprep.mubr.msk.f32.mxu0 %vm114_vm1, %v103_v17 }
  0x5d   :  { %1811 = vmatmul.mubr.msk.f32.gmra.mrb[6].mxu0 %vm114_vm1, %v104_v18 }
  0x5e   :  { %1821 = vmatprep.mubr.msk.f32.mxu0 %vm2280_vm0, %v2281_v1 }
  0x61   :  { %1822 = vmatmul.mubr.f32.vlgmr.msra.gmra.mrb[8].mxu0 %v2281_v1 }
  0x62   :  { %1970 = vmatpush3.bf16.msra.mxu0 %v2436_v8  ;;  %1843 = vmatprep.mubr.msk.f32.mxu0 %vm2280_vm0, %v2281_v1 }
  0x63   :  { %1971 = vmatprep.subr.bf16.mxu0 %v2279_v0 }
  0x66   :  { %1973 = vmatpush3.bf16.msra.mxu0 %v2448_v13 }
  0x67   :  { %1980 = vmatprep.subr.bf16.mxu0 %v2279_v0 }
  0xd0   :  { %v362_v53 = vpop.permute.xlu1 %361 }
  0xd1   :  { %vm363_vm3 = vcmp.eq.s32.totalorder %v362_v53, 1 }
 0x124   :  { %v1803_v23 = vpop.f32.mrb[0].mxu0 }
 0x125   :  { %v211_v24 = vadd.f32 %v1803_v23, %v1692_v22  ;;  %v205_v25 = vpop.f32.mrb[1].mxu0 }
 0x126   :  { %v206_v38 = vadd.f32 %v1692_v22, %v205_v25  ;;  %v651_v25 = vsel %vm650_vm7, 1, %v2282_v20 }
 0x128   :  { %v1806_v26 = vpop.f32.mrb[2].mxu0 }
 0x129   :  { %v2485_v27 = vadd.f32 %v1806_v26, %v1692_v22  ;;  %v215_v28 = vpop.f32.mrb[3].mxu0 }
 0x12a   :  { %v2487_v29 = vadd.f32 %v1692_v22, %v215_v28 }
 0x12c   :  { %v1809_v30 = vpop.f32.mrb[4].mxu0 }
 0x12d   :  { %v2489_v31 = vadd.f32 %v1809_v30, %v1692_v22  ;;  %v225_v32 = vpop.f32.mrb[5].mxu0 }
 0x12e   :  { %v2491_v33 = vadd.f32 %v1692_v22, %v225_v32 }
 0x130   :  { %v1812_v34 = vpop.f32.mrb[6].mxu0 }
 0x131   :  { %v2493_v35 = vadd.f32 %v1812_v34, %v1692_v22  ;;  %v235_v36 = vpop.f32.mrb[7].mxu0 }
 0x132   :  { %v2495_v37 = vadd.f32 %v1692_v22, %v235_v36 }
 0x134   :  { %v329_v39 = vpop.f32.mrb[8].mxu0 }
 0x135   :  { %v333_v40 = vadd.f32 %v329_v39, %v206_v38  ;;  %v1823_v41 = vpop.f32.mrb[9].mxu0 }
 0x137   :  { %2053 = vtanh.f32 %v333_v40  ;;  %v1701_v43 = vmul.f32 -1.442695, %v333_v40 }
 0x139   :  { %2055 = vpow2.f32 %v1701_v43 }
 0x141   :  { %v2054_v42 = vpop.eup %2053 }
 0x142   :  { %343 = vrot.lane.b32.xlu0 %v2054_v42, %s2283_s1 }
 0x143   :  { %v2056_v44 = vpop.eup %2055 }
 0x144   :  { %v337_v45 = vadd.f32 1.0, %v2056_v44 }
 0x146   :  { %2057 = vrcp.f32 %v337_v45 }
 0x150   :  { %v2058_v46 = vpop.eup %2057 }
 0x151   :  { %v341_v49 = vmul.f32 0.0, %v2058_v46 }
 0x1b4   :  { %v344_v47 = vpop.permute.xlu0 %343 }
 0x1b5   :  { %v346_v48 = vmul.f32 %v2058_v46, %v344_v47 }
 0x1b7   :  { %348 = vrot.lane.b32.xlu0 %v346_v48, %s2284_s5 }
 0x229   :  { %v349_v50 = vpop.permute.xlu0 %348 }
 0x22a   :  { %v351_v51 = vadd.f32 %v349_v50, %v341_v49 }
 0x22c   :  { %2059 = vtanh.f32 %v351_v51  ;;  %v364_v7 = vsel %vm363_vm3, %v351_v51, 0.0  ;;  %v793_v51 = vsel %vm792_vm9, 1, %v2282_v20 }
 0x236   :  { %v2060_v52 = vpop.eup %2059 }
 0x237   :  { %354 = vrot.lane.b32.xlu1 %v2060_v52, %s2283_s1 }
 0x2a9   :  { %v355_v54 = vpop.permute.xlu1 %354 }
 0x2aa   :  { %v357_v55 = vmul.f32 %v2058_v46, %v355_v54 }
 0x2ac   :  { %v2501_v56 = vsel %vm363_vm3, %v357_v55, 0.0  ;;  %vm1360_vm3 = vcmp.gt.s32.totalorder %v2474_v19, 7 }
 0x2ad   :  { %409 = vrot.lane.b32.xlu0 %v2501_v56, %s2284_s5 }
 0x31f   :  { %v410_v57 = vpop.permute.xlu0 %409 }
 0x320   :  { %1833 = vmatmul.mubr.msk.f32.vlgmr.msra.gmra.mrb[0].mxu1 %vm259_vm4, %v410_v57 }
 0x321   :  { %1976 = vmatpush3.bf16.msra.mxu1 %v2436_v8  ;;  %1854 = vmatprep.mubr.msk.f32.mxu1 %vm2280_vm0, %v2281_v1 }
 0x322   :  { %1977 = vmatprep.subr.bf16.mxu1 %v2279_v0 }
 0x325   :  { %1979 = vmatpush3.bf16.msra.mxu1 %v2448_v13 }
 0x326   :  { %1986 = vmatprep.subr.bf16.mxu1 %v2279_v0 }
 0x3f3   :  { %v479_v58 = vpop.f32.mrb[0].mxu1 }
 0x3f4   :  { %v483_v59 = vadd.f32 %v479_v58, %v211_v24  ;;  %v1834_v60 = vpop.f32.mrb[1].mxu1 }
 0x3f6   :  { %2061 = vtanh.f32 %v483_v59  ;;  %v1704_v63 = vmul.f32 -1.442695, %v483_v59 }
 0x3f8   :  { %2063 = vpow2.f32 %v1704_v63 }
 0x400   :  { %v2062_v61 = vpop.eup %2061 }
 0x401   :  { %493 = vrot.lane.b32.xlu1 %v2062_v61, %s2283_s1 }
 0x402   :  { %v2064_v2 = vpop.eup %2063 }
 0x403   :  { %v487_v3 = vadd.f32 1.0, %v2064_v2 }
 0x405   :  { %511 = vperm.xlu1 %2051, %v509_v62   ;;  %2065 = vrcp.f32 %v487_v3 }
 0x40f   :  { %v2066_v4 = vpop.eup %2065 }
 0x410   :  { %v491_v9 = vmul.f32 %v2066_v4, %v364_v7 }
 0x473   :  { %v494_v5 = vpop.permute.xlu1 %493 }
 0x474   :  { %v496_v6 = vmul.f32 %v2066_v4, %v494_v5 }
 0x476   :  { %498 = vrot.lane.b32.xlu0 %v496_v6, %s2284_s5 }
 0x484   :  { %v512_v14 = vpop.permute.xlu1 %511 }
 0x485   :  { %vm513_vm6 = vcmp.eq.s32.totalorder %v512_v14, 1 }
 0x4e8   :  { %v499_v10 = vpop.permute.xlu0 %498 }
 0x4e9   :  { %v501_v11 = vadd.f32 %v499_v10, %v491_v9 }
 0x4eb   :  { %2067 = vtanh.f32 %v501_v11  ;;  %v514_v36 = vsel %vm513_vm6, %v501_v11, %v364_v7  ;;  %v935_v11 = vsel %vm934_vm11, 1, %v2282_v20 }
 0x4f5   :  { %v2068_v12 = vpop.eup %2067 }
 0x4f6   :  { %504 = vrot.lane.b32.xlu0 %v2068_v12, %s2283_s1 }
 0x568   :  { %v505_v15 = vpop.permute.xlu0 %504 }
 0x569   :  { %v507_v16 = vmul.f32 %v2066_v4, %v505_v15 }
 0x56b   :  { %v2522_v17 = vsel %vm513_vm6, %v507_v16, %v2501_v56 }
 0x56c   :  { %551 = vrot.lane.b32.xlu1 %v2522_v17, %s2284_s5 }
 0x5de   :  { %v552_v18 = vpop.permute.xlu1 %551 }
 0x5df   :  { %1844 = vmatmul.mubr.msk.f32.vlgmr.msra.gmra.mrb[10].mxu0 %vm259_vm4, %v552_v18 }
 0x5e0   :  { %1982 = vmatpush3.bf16.msra.mxu0 %v2436_v8  ;;  %1865 = vmatprep.mubr.msk.f32.mxu0 %vm2280_vm0, %v2281_v1 }
 0x5e1   :  { %1983 = vmatprep.subr.bf16.mxu0 %v2279_v0 }
 0x5e4   :  { %1985 = vmatpush3.bf16.msra.mxu0 %v2448_v13 }
 0x5e5   :  { %1992 = vmatprep.subr.bf16.mxu0 %v2279_v0 }
 0x6b2   :  { %v621_v21 = vpop.f32.mrb[10].mxu0 }
 0x6b3   :  { %v625_v22 = vadd.f32 %v621_v21, %v2487_v29  ;;  %v1845_v23 = vpop.f32.mrb[11].mxu0 }
 0x6b5   :  { %2069 = vtanh.f32 %v625_v22  ;;  %v1706_v26 = vmul.f32 -1.442695, %v625_v22 }
 0x6b7   :  { %2071 = vpow2.f32 %v1706_v26 }
 0x6bf   :  { %v2070_v24 = vpop.eup %2069 }
 0x6c0   :  { %635 = vrot.lane.b32.xlu0 %v2070_v24, %s2283_s1 }
 0x6c1   :  { %v2072_v28 = vpop.eup %2071 }
 0x6c2   :  { %v629_v30 = vadd.f32 1.0, %v2072_v28 }
 0x6c4   :  { %653 = vperm.xlu0 %2052, %v651_v25   ;;  %2073 = vrcp.f32 %v629_v30 }
 0x6ce   :  { %v2074_v32 = vpop.eup %2073 }
 0x6cf   :  { %v633_v38 = vmul.f32 %v2074_v32, %v514_v36 }
 0x732   :  { %v636_v34 = vpop.permute.xlu0 %635 }
 0x733   :  { %v638_v29 = vmul.f32 %v2074_v32, %v636_v34 }
 0x735   :  { %640 = vrot.lane.b32.xlu1 %v638_v29, %s2284_s5 }
 0x743   :  { %v654_v42 = vpop.permute.xlu0 %653 }
 0x744   :  { %vm655_vm8 = vcmp.eq.s32.totalorder %v654_v42, 1 }
 0x7a7   :  { %v641_v39 = vpop.permute.xlu1 %640 }
 0x7a8   :  { %v643_v40 = vadd.f32 %v641_v39, %v633_v38 }
 0x7aa   :  { %2075 = vtanh.f32 %v643_v40  ;;  %v656_v58 = vsel %vm655_vm8, %v643_v40, %v514_v36 }
 0x7b4   :  { %v2076_v41 = vpop.eup %2075 }
 0x7b5   :  { %646 = vrot.lane.b32.xlu1 %v2076_v41, %s2283_s1 }
 0x827   :  { %v647_v43 = vpop.permute.xlu1 %646 }
 0x828   :  { %v649_v44 = vmul.f32 %v2074_v32, %v647_v43 }
 0x82a   :  { %v2544_v45 = vsel %vm655_vm8, %v649_v44, %v2522_v17 }
 0x82b   :  { %693 = vrot.lane.b32.xlu1 %v2544_v45, %s2284_s5 }
 0x89d   :  { %v694_v46 = vpop.permute.xlu1 %693 }
 0x89e   :  { %1855 = vmatmul.mubr.msk.f32.vlgmr.msra.gmra.mrb[2].mxu1 %vm259_vm4, %v694_v46 }
 0x89f   :  { %1988 = vmatpush3.bf16.msra.mxu1 %v2436_v8  ;;  %1876 = vmatprep.mubr.msk.f32.mxu1 %vm2280_vm0, %v2281_v1 }
 0x8a0   :  { %1989 = vmatprep.subr.bf16.mxu1 %v2279_v0 }
 0x8a3   :  { %1991 = vmatpush3.bf16.msra.mxu1 %v2448_v13 }
 0x8a4   :  { %1998 = vmatprep.subr.bf16.mxu1 %v2279_v0 }
 0x971   :  { %v763_v47 = vpop.f32.mrb[2].mxu1 }
 0x972   :  { %v767_v48 = vadd.f32 %v763_v47, %v2485_v27  ;;  %v1856_v49 = vpop.f32.mrb[3].mxu1 }
 0x974   :  { %2077 = vtanh.f32 %v767_v48  ;;  %v1708_v52 = vmul.f32 -1.442695, %v767_v48 }
 0x976   :  { %2079 = vpow2.f32 %v1708_v52 }
 0x97e   :  { %v2078_v50 = vpop.eup %2077 }
 0x97f   :  { %777 = vrot.lane.b32.xlu0 %v2078_v50, %s2283_s1 }
 0x980   :  { %v2080_v53 = vpop.eup %2079 }
 0x981   :  { %v771_v54 = vadd.f32 1.0, %v2080_v53 }
 0x983   :  { %795 = vperm.xlu0 %2052, %v793_v51   ;;  %2081 = vrcp.f32 %v771_v54 }
 0x98d   :  { %v2082_v55 = vpop.eup %2081 }
 0x98e   :  { %v775_v59 = vmul.f32 %v2082_v55, %v656_v58 }
 0x9f1   :  { %v778_v57 = vpop.permute.xlu0 %777 }
 0x9f2   :  { %v780_v27 = vmul.f32 %v2082_v55, %v778_v57 }
 0x9f4   :  { %782 = vrot.lane.b32.xlu1 %v780_v27, %s2284_s5 }
 0xa02   :  { %v796_v63 = vpop.permute.xlu0 %795 }
 0xa03   :  { %vm797_vm10 = vcmp.eq.s32.totalorder %v796_v63, 1 }
 0xa66   :  { %v783_v60 = vpop.permute.xlu1 %782 }
 0xa67   :  { %v785_v61 = vadd.f32 %v783_v60, %v775_v59  ;;  %v1219_v59 = vsel %vm1218_vm15, 1, %v2282_v20 }
 0xa69   :  { %2083 = vtanh.f32 %v785_v61  ;;  %v798_v21 = vsel %vm797_vm10, %v785_v61, %v656_v58 }
 0xa73   :  { %v2084_v62 = vpop.eup %2083 }
 0xa74   :  { %788 = vrot.lane.b32.xlu1 %v2084_v62, %s2283_s1 }
 0xae6   :  { %v789_v2 = vpop.permute.xlu1 %788 }
 0xae7   :  { %v791_v3 = vmul.f32 %v2082_v55, %v789_v2 }
 0xae9   :  { %v2566_v4 = vsel %vm797_vm10, %v791_v3, %v2544_v45 }
 0xaea   :  { %835 = vrot.lane.b32.xlu0 %v2566_v4, %s2284_s5 }
 0xb5c   :  { %v836_v5 = vpop.permute.xlu0 %835 }
 0xb5d   :  { %1866 = vmatmul.mubr.msk.f32.vlgmr.msra.gmra.mrb[12].mxu0 %vm259_vm4, %v836_v5 }
 0xb5e   :  { %1994 = vmatpush3.bf16.msra.mxu0 %v2436_v8  ;;  %1887 = vmatprep.mubr.msk.f32.mxu0 %vm2280_vm0, %v2281_v1 }
 0xb5f   :  { %1995 = vmatprep.subr.bf16.mxu0 %v2279_v0 }
 0xb62   :  { %1997 = vmatpush3.bf16.msra.mxu0 %v2448_v13 }
 0xb63   :  { %2004 = vmatprep.subr.bf16.mxu0 %v2279_v0 }
 0xc30   :  { %v905_v6 = vpop.f32.mrb[12].mxu0 }
 0xc31   :  { %v909_v7 = vadd.f32 %v905_v6, %v2491_v33  ;;  %v1867_v9 = vpop.f32.mrb[13].mxu0 }
 0xc33   :  { %2085 = vtanh.f32 %v909_v7  ;;  %v1710_v12 = vmul.f32 -1.442695, %v909_v7 }
 0xc35   :  { %2087 = vpow2.f32 %v1710_v12 }
 0xc3d   :  { %v2086_v10 = vpop.eup %2085 }
 0xc3e   :  { %919 = vrot.lane.b32.xlu1 %v2086_v10, %s2283_s1 }
 0xc3f   :  { %v2088_v14 = vpop.eup %2087 }
 0xc40   :  { %v913_v15 = vadd.f32 1.0, %v2088_v14 }
 0xc42   :  { %937 = vperm.xlu1 %2051, %v935_v11   ;;  %2089 = vrcp.f32 %v913_v15 }
 0xc4c   :  { %v2090_v16 = vpop.eup %2089 }
 0xc4d   :  { %v917_v22 = vmul.f32 %v2090_v16, %v798_v21 }
 0xcb0   :  { %v920_v18 = vpop.permute.xlu1 %919 }
 0xcb1   :  { %v922_v33 = vmul.f32 %v2090_v16, %v920_v18 }
 0xcb3   :  { %924 = vrot.lane.b32.xlu0 %v922_v33, %s2284_s5 }
 0xcc1   :  { %v938_v26 = vpop.permute.xlu1 %937 }
 0xcc2   :  { %vm939_vm12 = vcmp.eq.s32.totalorder %v938_v26, 1 }
 0xd25   :  { %v925_v23 = vpop.permute.xlu0 %924 }
 0xd26   :  { %v927_v24 = vadd.f32 %v925_v23, %v917_v22  ;;  %v1702_v22 = vld [vmem:[%s2763_s6] ss:$0 sm:$0xff] }
 0xd28   :  { %2091 = vtanh.f32 %v927_v24  ;;  %v940_v44 = vsel %vm939_vm12, %v927_v24, %v798_v21 }
 0xd32   :  { %v2092_v25 = vpop.eup %2091 }
 0xd33   :  { %930 = vrot.lane.b32.xlu0 %v2092_v25, %s2283_s1 }
 0xda5   :  { %v931_v28 = vpop.permute.xlu0 %930 }
 0xda6   :  { %v933_v30 = vmul.f32 %v2090_v16, %v931_v28 }
 0xda8   :  { %v2588_v32 = vsel %vm939_vm12, %v933_v30, %v2566_v4 }
 0xda9   :  { %977 = vrot.lane.b32.xlu1 %v2588_v32, %s2284_s5 }
 0xe1b   :  { %v978_v34 = vpop.permute.xlu1 %977 }
 0xe1c   :  { %1877 = vmatmul.mubr.msk.f32.vlgmr.msra.gmra.mrb[4].mxu1 %vm259_vm4, %v978_v34 }
 0xe1d   :  { %2000 = vmatpush3.bf16.msra.mxu1 %v2436_v8  ;;  %1898 = vmatprep.mubr.msk.f32.mxu1 %vm2280_vm0, %v2281_v1  ;;  %v1077_v8 = vsel %vm1076_vm13, 1, %v2282_v20 }
 0xe1e   :  { %2001 = vmatprep.subr.bf16.mxu1 %v2279_v0 }
 0xe21   :  { %2003 = vmatpush3.bf16.msra.mxu1 %v2448_v13 }
 0xe22   :  { %2010 = vmatprep.subr.bf16.mxu1 %v2279_v0 }
 0xeef   :  { %v1047_v29 = vpop.f32.mrb[4].mxu1 }
 0xef0   :  { %v1051_v36 = vadd.f32 %v1047_v29, %v2489_v31  ;;  %v1878_v38 = vpop.f32.mrb[5].mxu1 }
 0xef2   :  { %2093 = vtanh.f32 %v1051_v36  ;;  %v1712_v40 = vmul.f32 -1.442695, %v1051_v36 }
 0xef4   :  { %2095 = vpow2.f32 %v1712_v40 }
 0xefc   :  { %v2094_v39 = vpop.eup %2093 }
 0xefd   :  { %1061 = vrot.lane.b32.xlu0 %v2094_v39, %s2283_s1 }
 0xefe   :  { %v2096_v13 = vpop.eup %2095 }
 0xeff   :  { %v1055_v41 = vadd.f32 1.0, %v2096_v13 }
 0xf01   :  { %1079 = vperm.xlu0 %2052, %v1077_v8   ;;  %2097 = vrcp.f32 %v1055_v41 }
 0xf0b   :  { %v2098_v42 = vpop.eup %2097 }
 0xf0c   :  { %v1059_v46 = vmul.f32 %v2098_v42, %v940_v44 }
 0xf6f   :  { %v1062_v43 = vpop.permute.xlu0 %1061 }
 0xf70   :  { %v1064_v31 = vmul.f32 %v2098_v42, %v1062_v43 }
 0xf72   :  { %1066 = vrot.lane.b32.xlu1 %v1064_v31, %s2284_s5 }
 0xf80   :  { %v1080_v50 = vpop.permute.xlu0 %1079 }
 0xf81   :  { %vm1081_vm14 = vcmp.eq.s32.totalorder %v1080_v50, 1 }
 0xfe4   :  { %v1067_v47 = vpop.permute.xlu1 %1066 }
 0xfe5   :  { %v1069_v48 = vadd.f32 %v1067_v47, %v1059_v46 }
 0xfe7   :  { %2099 = vtanh.f32 %v1069_v48  ;;  %v1082_v3 = vsel %vm1081_vm14, %v1069_v48, %v940_v44 }
 0xff1   :  { %v2100_v49 = vpop.eup %2099 }
 0xff2   :  { %1072 = vrot.lane.b32.xlu1 %v2100_v49, %s2283_s1 }
0x1064   :  { %v1073_v51 = vpop.permute.xlu1 %1072 }
0x1065   :  { %v1075_v52 = vmul.f32 %v2098_v42, %v1073_v51 }
0x1067   :  { %v2610_v53 = vsel %vm1081_vm14, %v1075_v52, %v2588_v32 }
0x1068   :  { %1119 = vrot.lane.b32.xlu0 %v2610_v53, %s2284_s5 }
0x10da   :  { %v1120_v54 = vpop.permute.xlu0 %1119 }
0x10db   :  { %1888 = vmatmul.mubr.msk.f32.vlgmr.msra.gmra.mrb[14].mxu0 %vm259_vm4, %v1120_v54 }
0x10dc   :  { %1909 = vmatprep.mubr.msk.f32.mxu0 %vm2280_vm0, %v2281_v1 }
0x11ae   :  { %v1189_v55 = vpop.f32.mrb[14].mxu0 }
0x11af   :  { %v1193_v57 = vadd.f32 %v1189_v55, %v2495_v37  ;;  %v1889_v27 = vpop.f32.mrb[15].mxu0 }
0x11b1   :  { %2101 = vtanh.f32 %v1193_v57  ;;  %v1714_v60 = vmul.f32 -1.442695, %v1193_v57 }
0x11b3   :  { %2103 = vpow2.f32 %v1714_v60 }
0x11bb   :  { %v2102_v58 = vpop.eup %2101 }
0x11bc   :  { %1203 = vrot.lane.b32.xlu1 %v2102_v58, %s2283_s1 }
0x11bd   :  { %v2104_v61 = vpop.eup %2103 }
0x11be   :  { %v1197_v62 = vadd.f32 1.0, %v2104_v61 }
0x11c0   :  { %1221 = vperm.xlu1 %2051, %v1219_v59   ;;  %2105 = vrcp.f32 %v1197_v62 }
0x11ca   :  { %v2106_v63 = vpop.eup %2105 }
0x11cb   :  { %v1201_v5 = vmul.f32 %v2106_v63, %v1082_v3 }
0x122e   :  { %v1204_v2 = vpop.permute.xlu1 %1203 }
0x122f   :  { %v1206_v37 = vmul.f32 %v2106_v63, %v1204_v2 }
0x1231   :  { %1208 = vrot.lane.b32.xlu0 %v1206_v37, %s2284_s5 }
0x123f   :  { %v1222_v10 = vpop.permute.xlu1 %1221 }
0x1240   :  { %vm1223_vm1 = vcmp.eq.s32.totalorder %v1222_v10, 1 }
0x12a3   :  { %v1209_v6 = vpop.permute.xlu0 %1208 }
0x12a4   :  { %v1211_v7 = vadd.f32 %v1209_v6, %v1201_v5 }
0x12a6   :  { %2107 = vtanh.f32 %v1211_v7 }
0x12b0   :  { %v2108_v9 = vpop.eup %2107 }
0x12b1   :  { %1214 = vrot.lane.b32.xlu0 %v2108_v9, %s2283_s1 }
0x1323   :  { %v1215_v11 = vpop.permute.xlu0 %1214 }
0x1324   :  { %v1217_v12 = vmul.f32 %v2106_v63, %v1215_v11 }
0x1326   :  { %v2628_v14 = vsel %vm1223_vm1, %v1217_v12, %v2610_v53 }
0x1327   :  { %1261 = vrot.lane.b32.xlu1 %v2628_v14, %s2284_s5 }
0x1399   :  { %v1262_v15 = vpop.permute.xlu1 %1261 }
0x139a   :  { %1899 = vmatmul.mubr.msk.f32.vlgmr.msra.gmra.mrb[6].mxu1 %vm259_vm4, %v1262_v15 }
0x139b   :  { %1949 = vmatprep.mubr.msk.f32.mxu1 %vm2280_vm0, %v2281_v1 }
0x146d   :  { %v1331_v16 = vpop.f32.mrb[6].mxu1 }
0x146e   :  { %v1335_v18 = vadd.f32 %v1331_v16, %v2493_v35  ;;  %v1900_v33 = vpop.f32.mrb[7].mxu1  ;;  %v1361_v35 = vsel %vm1360_vm3, 1, %v2282_v20  ;;  %v1224_v20 = vsel %vm1223_vm1, %v1211_v7, %v1082_v3 }
0x1470   :  { %2109 = vtanh.f32 %v1335_v18  ;;  %v1716_v23 = vmul.f32 -1.442695, %v1335_v18 }
0x1472   :  { %2111 = vpow2.f32 %v1716_v23 }
0x147a   :  { %v2110_v21 = vpop.eup %2109 }
0x147b   :  { %1345 = vrot.lane.b32.xlu0 %v2110_v21, %s2283_s1 }
0x147c   :  { %v2112_v24 = vpop.eup %2111 }
0x147d   :  { %v1339_v25 = vadd.f32 1.0, %v2112_v24 }
0x147f   :  { %371 = vrot.lane.b32.xlu0 %v1702_v22, %s2285_s28  ;;  %2113 = vrcp.f32 %v1339_v25 }
0x1489   :  { %v2114_v26 = vpop.eup %2113 }
0x148a   :  { %v1343_v8 = vmul.f32 %v2114_v26, %v1224_v20 }
0x14ed   :  { %v1346_v28 = vpop.permute.xlu0 %1345 }
0x14ee   :  { %v1348_v30 = vmul.f32 %v2114_v26, %v1346_v28 }
0x14f0   :  { %1350 = vrot.lane.b32.xlu1 %v1348_v30, %s2284_s5 }
0x14f1   :  { %v372_v34 = vpop.permute.xlu0 %371 }
0x14f2   :  { %v374_v29 = vmul.f32 %v372_v34, %v2501_v56  ;;  %v658_v36 = vmul.f32 %v2544_v45, %v372_v34  ;;  %v942_v38 = vmul.f32 %v2588_v32, %v372_v34  ;;  %v1226_v39 = vmul.f32 %v2628_v14, %v372_v34 }
0x14f3   :  { %v516_v42 = vmul.f32 %v2522_v17, %v372_v34  ;;  %v800_v31 = vmul.f32 %v2566_v4, %v372_v34  ;;  %v1084_v47 = vmul.f32 %v2610_v53, %v372_v34 }
0x14f4   :  { %1363 = vperm.xlu1 %2051, %v1361_v35  }
0x14f8   :  { %376 = vrot.lane.b32.xlu1 %v374_v29, %s2284_s5 }
0x14fc   :  { %660 = vrot.lane.b32.xlu1 %v658_v36, %s2284_s5 }
0x1500   :  { %944 = vrot.lane.b32.xlu1 %v942_v38, %s2284_s5 }
0x1504   :  { %1228 = vrot.lane.b32.xlu1 %v1226_v39, %s2284_s5 }
0x1562   :  { %v1351_v40 = vpop.permute.xlu1 %1350 }
0x1563   :  { %v1353_v13 = vadd.f32 %v1351_v40, %v1343_v8 }
0x1565   :  { %2115 = vtanh.f32 %v1353_v13 }
0x156f   :  { %v2116_v41 = vpop.eup %2115 }
0x1570   :  { %1356 = vrot.lane.b32.xlu0 %v2116_v41, %s2283_s1 }
0x1573   :  { %v1364_v43 = vpop.permute.xlu1 %1363 }
0x1574   :  { %518 = vrot.lane.b32.xlu0 %v516_v42, %s2284_s5  ;;  %vm1365_vm6 = vcmp.eq.s32.totalorder %v1364_v43, 1 }
0x1577   :  { %v377_v44 = vpop.permute.xlu1 %376 }
0x1578   :  { %802 = vrot.lane.b32.xlu0 %v800_v31, %s2284_s5  ;;  %v379_v46 = vsel %vm259_vm4, %v377_v44, 0.0 }
0x1579   :  { %380 = vadd.xlane.f32.xlu1 %v379_v46 }
0x157b   :  { %v661_v58 = vpop.permute.xlu1 %660 }
0x157c   :  { %1086 = vrot.lane.b32.xlu0 %v1084_v47, %s2284_s5  ;;  %v663_v62 = vsel %vm259_vm4, %v661_v58, 0.0 }
0x157f   :  { %v945_v59 = vpop.permute.xlu1 %944 }
0x1580   :  { %v947_v2 = vsel %vm259_vm4, %v945_v59, 0.0 }
0x1583   :  { %v1229_v61 = vpop.permute.xlu1 %1228 }
0x1584   :  { %v1231_v5 = vsel %vm259_vm4, %v1229_v61, 0.0 }
0x15e2   :  { %v1357_v48 = vpop.permute.xlu0 %1356 }
0x15e3   :  { %v1359_v49 = vmul.f32 %v2114_v26, %v1357_v48 }
0x15e5   :  { %v2663_v50 = vsel %vm1365_vm6, %v1359_v49, %v2628_v14 }
0x15e6   :  { %v519_v51 = vpop.permute.xlu0 %518  ;;  %v1367_v52 = vmul.f32 %v2663_v50, %v372_v34 }
0x15e7   :  { %v521_v60 = vsel %vm259_vm4, %v519_v51, 0.0 }
0x15e8   :  { %1369 = vrot.lane.b32.xlu0 %v1367_v52, %s2284_s5 }
0x15ea   :  { %v803_v54 = vpop.permute.xlu0 %802 }
0x15eb   :  { %v805_v55 = vsel %vm259_vm4, %v803_v54, 0.0 }
0x15ec   :  { %806 = vadd.xlane.f32.xlu1 %v805_v55 }
0x15ee   :  { %v1087_v57 = vpop.permute.xlu0 %1086 }
0x15ef   :  { %v1089_v27 = vsel %vm259_vm4, %v1087_v57, 0.0 }
0x15f0   :  { %1090 = vadd.xlane.f32.xlu1 %v1089_v27 }
0x1606   :  { %v381_v63 = vpop.xlane.xlu1 %380 }
0x1607   :  { %522 = vadd.xlane.f32.xlu0 %v521_v60  ;;  %v382_v37 = vsel %vm358_vm2, %v381_v63, -1e+30 }
0x1608   :  { %v383_v3 = vmax.f32 %v382_v37, -1e+30 }
0x160a   :  { %v384_v6 = vsub.f32 -1e+30, %v383_v3  ;;  %v387_v10 = vsub.f32 %v382_v37, %v383_v3 }
0x160b   :  { %664 = vadd.xlane.f32.xlu0 %v663_v62 }
0x160c   :  { %v385_v7 = vmul.f32 1.442695, %v384_v6  ;;  %v388_v12 = vmul.f32 1.442695, %v387_v10 }
0x160e   :  { %2117 = vpow2.f32 %v385_v7 }
0x160f   :  { %948 = vadd.xlane.f32.xlu0 %v947_v2  ;;  %2119 = vpow2.f32 %v388_v12 }
0x1613   :  { %1232 = vadd.xlane.f32.xlu0 %v1231_v5 }
0x1618   :  { %v2118_v9 = vpop.eup %2117 }
0x1619   :  { %v2120_v16 = vpop.eup %2119  ;;  %v391_v31 = vmul.f32 0.0, %v2118_v9 }
0x161a   :  { %v390_v18 = vsel %vm358_vm2, %v2120_v16, 0.0  ;;  %vm1499_vm2 = vcmask 1043456  }
0x161b   :  { %v392_v61 = vadd.f32 %v391_v31, %v390_v18 }
0x1629   :  { %395 = vperm.xlu0 %2052, %v2118_v9  }
0x165a   :  { %v1370_v11 = vpop.permute.xlu0 %1369 }
0x165b   :  { %v1372_v15 = vsel %vm259_vm4, %v1370_v11, 0.0 }
0x165c   :  { %1373 = vadd.xlane.f32.xlu1 %v1372_v15 }
0x166d   :  { %401 = vperm.xlu1 %2051, %v390_v18  }
0x1679   :  { %v807_v22 = vpop.xlane.xlu1 %806 }
0x167a   :  { %v808_v29 = vsel %vm792_vm9, %v807_v22, -1e+30 }
0x167d   :  { %v1091_v36 = vpop.xlane.xlu1 %1090 }
0x167e   :  { %v1092_v44 = vsel %vm1076_vm13, %v1091_v36, -1e+30 }
0x1694   :  { %v523_v33 = vpop.xlane.xlu0 %522 }
0x1695   :  { %v524_v21 = vsel %vm508_vm5, %v523_v33, -1e+30 }
0x1696   :  { %v525_v23 = vmax.f32 %v383_v3, %v524_v21 }
0x1698   :  { %v526_v24 = vsub.f32 %v383_v3, %v525_v23  ;;  %v529_v25 = vsub.f32 %v524_v21, %v525_v23  ;;  %v665_v26 = vpop.xlane.xlu0 %664 }
0x1699   :  { %v666_v28 = vsel %vm650_vm7, %v665_v26, -1e+30 }
0x169a   :  { %v527_v30 = vmul.f32 1.442695, %v526_v24  ;;  %v530_v35 = vmul.f32 1.442695, %v529_v25  ;;  %v667_v34 = vmax.f32 %v525_v23, %v666_v28 }
0x169c   :  { %2121 = vpow2.f32 %v527_v30  ;;  %v668_v38 = vsub.f32 %v525_v23, %v667_v34  ;;  %v671_v39 = vsub.f32 %v666_v28, %v667_v34  ;;  %v809_v20 = vmax.f32 %v667_v34, %v808_v29  ;;  %v949_v8 = vpop.xlane.xlu0 %948 }
0x169d   :  { %2123 = vpow2.f32 %v530_v35  ;;  %v950_v40 = vsel %vm934_vm11, %v949_v8, -1e+30 }
0x169e   :  { %v669_v13 = vmul.f32 1.442695, %v668_v38  ;;  %v672_v41 = vmul.f32 1.442695, %v671_v39  ;;  %v810_v42 = vsub.f32 %v667_v34, %v809_v20  ;;  %v951_v43 = vmax.f32 %v809_v20, %v950_v40 }
0x169f   :  { %v813_v46 = vsub.f32 %v808_v29, %v809_v20 }
0x16a0   :  { %2125 = vpow2.f32 %v669_v13  ;;  %v811_v47 = vmul.f32 1.442695, %v810_v42  ;;  %v952_v48 = vsub.f32 %v809_v20, %v951_v43  ;;  %v955_v49 = vsub.f32 %v950_v40, %v951_v43  ;;  %v1233_v51 = vpop.xlane.xlu0 %1232 }
0x16a1   :  { %2127 = vpow2.f32 %v672_v41  ;;  %v1093_v52 = vmax.f32 %v951_v43, %v1092_v44  ;;  %v1234_v54 = vsel %vm1218_vm15, %v1233_v51, -1e+30  ;;  %v814_v55 = vmul.f32 1.442695, %v813_v46 }
0x16a2   :  { %v956_v57 = vmul.f32 1.442695, %v955_v49  ;;  %v953_v59 = vmul.f32 1.442695, %v952_v48 }
0x16a3   :  { %v2690_v27 = vmax.f32 %v1093_v52, %v1234_v54  ;;  %2129 = vpow2.f32 %v814_v55  ;;  %v1097_v58 = vsub.f32 %v1092_v44, %v1093_v52  ;;  %v1094_v60 = vsub.f32 %v951_v43, %v1093_v52 }
0x16a4   :  { %2131 = vpow2.f32 %v811_v47 }
0x16a5   :  { %2133 = vpow2.f32 %v956_v57  ;;  %v1239_v2 = vsub.f32 %v1234_v54, %v2690_v27  ;;  %v1098_v3 = vmul.f32 1.442695, %v1097_v58  ;;  %v1095_v5 = vmul.f32 1.442695, %v1094_v60  ;;  %v1408_v60 = vld [vmem:[#allocation8 + $0x8] sm:$0xff] }
0x16a6   :  { %v2122_v62 = vpop.eup %2121  ;;  %2135 = vpow2.f32 %v953_v59  ;;  %v1236_v6 = vsub.f32 %v1093_v52, %v2690_v27 }
0x16a7   :  { %v2124_v63 = vpop.eup %2123  ;;  %537 = vperm.xlu1 %2051, %v2122_v62   ;;  %v533_v37 = vmul.f32 %v2122_v62, %v392_v61  ;;  %v1240_v12 = vmul.f32 1.442695, %v1239_v2  ;;  %2137 = vpow2.f32 %v1098_v3  ;;  %v1409_v61 = vld [vmem:[#allocation8 + $0x10] sm:$0xff] }
0x16a8   :  { %v532_v7 = vsel %vm508_vm5, %v2124_v63, 0.0  ;;  %2139 = vpow2.f32 %v1095_v5  ;;  %v1237_v16 = vmul.f32 1.442695, %v1236_v6  ;;  %v1410_v63 = vld [vmem:[#allocation8 + $0x18] sm:$0xff]  ;;  %vm1495_vm5 = vcmask 31744  }
0x16a9   :  { %543 = vperm.xlu0 %2052, %v532_v7   ;;  %v534_v9 = vadd.f32 %v533_v37, %v532_v7  ;;  %2141 = vpow2.f32 %v1240_v12  ;;  %v2008_v2 = vpack.c.bf16 %v1410_v63, %v1409_v61  ;;  %v396_v37 = vpop.permute.xlu0 %395  ;;  %v1586_v61 = vld [vmem:[#allocation9 + $0x58] sm:$0xff]  ;;  %v1587_v63 = vld [vmem:[#allocation9 + $0x60] sm:$0xff] }
0x16aa   :  { %v2126_v10 = vpop.eup %2125  ;;  %2143 = vpow2.f32 %v1237_v16  ;;  %v398_v5 = vmul.f32 0.0, %v396_v37  ;;  %v1494_v37 = vld [vmem:[%s2765_s8] sm:$0xf] }
0x16ab   :  { %v2128_v11 = vpop.eup %2127  ;;  %679 = vperm.xlu1 %2051, %v2126_v10   ;;  %v675_v15 = vmul.f32 %v2126_v10, %v534_v9 }
0x16ac   :  { %v674_v18 = vsel %vm650_vm7, %v2128_v11, 0.0 }
0x16ad   :  { %v2130_v33 = vpop.eup %2129  ;;  %685 = vperm.xlu0 %2052, %v674_v18   ;;  %v676_v21 = vadd.f32 %v675_v15, %v674_v18 }
0x16ae   :  { %v2132_v22 = vpop.eup %2131  ;;  %v816_v24 = vsel %vm792_vm9, %v2130_v33, 0.0 }
0x16af   :  { %821 = vperm.xlu1 %2051, %v2132_v22   ;;  %v817_v23 = vmul.f32 %v2132_v22, %v676_v21  ;;  %v2134_v25 = vpop.eup %2133 }
0x16b0   :  { %v2136_v28 = vpop.eup %2135  ;;  %v958_v35 = vsel %vm934_vm11, %v2134_v25, 0.0 }
0x16b1   :  { %827 = vperm.xlu0 %2052, %v816_v24   ;;  %v818_v26 = vadd.f32 %v817_v23, %v816_v24  ;;  %v2138_v34 = vpop.eup %2137 }
0x16b2   :  { %v2140_v36 = vpop.eup %2139  ;;  %v1100_v39 = vsel %vm1076_vm13, %v2138_v34, 0.0 }
0x16b3   :  { %963 = vperm.xlu1 %2051, %v2136_v28   ;;  %v959_v30 = vmul.f32 %v2136_v28, %v818_v26  ;;  %v2142_v20 = vpop.eup %2141 }
0x16b4   :  { %v2144_v40 = vpop.eup %2143  ;;  %v1242_v41 = vsel %vm1218_vm15, %v2142_v20, 0.0 }
0x16b5   :  { %969 = vperm.xlu0 %2052, %v958_v35   ;;  %v960_v29 = vadd.f32 %v959_v30, %v958_v35 }
0x16b7   :  { %1105 = vperm.xlu1 %2051, %v2140_v36   ;;  %v1101_v38 = vmul.f32 %v2140_v36, %v960_v29 }
0x16b9   :  { %1111 = vperm.xlu0 %2052, %v1100_v39   ;;  %v1102_v8 = vadd.f32 %v1101_v38, %v1100_v39 }
0x16bb   :  { %1247 = vperm.xlu1 %2051, %v2144_v40   ;;  %v1243_v13 = vmul.f32 %v2144_v40, %v1102_v8 }
0x16bd   :  { %1253 = vperm.xlu0 %2052, %v1242_v41   ;;  %v1244_v49 = vadd.f32 %v1243_v13, %v1242_v41 }
0x16e9   :  { %v1374_v42 = vpop.xlane.xlu1 %1373 }
0x16ea   :  { %v1375_v43 = vsel %vm1360_vm3, %v1374_v42, -1e+30 }
0x16eb   :  { %v1376_v31 = vmax.f32 %v2690_v27, %v1375_v43 }
0x16ed   :  { %v1377_v44 = vsub.f32 %v2690_v27, %v1376_v31  ;;  %v1380_v46 = vsub.f32 %v1375_v43, %v1376_v31  ;;  %v1407_v27 = vld [vmem:[#allocation8] sm:$0xff]  ;;  %v402_v19 = vpop.permute.xlu1 %401 }
0x16ee   :  { %v2005_v62 = vpack.c.bf16 %v1408_v60, %v1407_v27  ;;  %v404_v3 = vmul.f32 %v402_v19, %v2501_v56  ;;  %v1575_v31 = vld [vmem:[#allocation9] sm:$0xff]  ;;  %v1585_v60 = vld [vmem:[#allocation9 + $0x50] sm:$0xff] }
0x16ef   :  { %v1378_v47 = vmul.f32 1.442695, %v1377_v44  ;;  %v1381_v48 = vmul.f32 1.442695, %v1380_v46  ;;  %v1577_v44 = vld [vmem:[#allocation9 + $0x10] sm:$0xff] }
0x16f0   :  { %2006 = vmatpush3.bf16.msra.mxu0 %v2005_v62  ;;  %v405_v9 = vadd.f32 %v404_v3, %v398_v5  ;;  %v2026_v62 = vpack.c.bf16 %v1586_v61, %v1585_v60  ;;  %v1493_v5 = vld [vmem:[%s2759_s2] sm:$0xff]  ;;  %s2286_s2 = smov [#allocation11]  }
0x16f1   :  { %2145 = vpow2.f32 %v1378_v47  ;;  %2007 = vmatprep.subr.bf16.mxu0 %v2279_v0  ;;  %s1681_s7 = sshll.u32 %s2286_s2, 4  ;;  %s1682_s7 = int_to_ptr.vmem [resolvable:$true] %s1681_s7 }
0x16f2   :  { %2147 = vpow2.f32 %v1381_v48  ;;  %v1578_v48 = vld [vmem:[#allocation9 + $0x18] sm:$0xff]  ;;  %p2248_p5 = scmp.lt.s32.totalorder %s1682_s7, %s1682_s7 }
0x16f4   :  { %2009 = vmatpush3.bf16.msra.mxu0 %v2008_v2  ;;  %v1588_v2 = vld [vmem:[#allocation9 + $0x68] sm:$0xff] }
0x16f5   :  { %1912 = vmatprep.subr.mxu0 %v2281_v1  ;;  %v2029_v19 = vpack.c.bf16 %v1588_v2, %v1587_v63 }
0x16fb   :  { %v2146_v51 = vpop.eup %2145 }
0x16fc   :  { %v2148_v52 = vpop.eup %2147  ;;  %1388 = vperm.xlu1 %2051, %v2146_v51   ;;  %v1384_v54 = vmul.f32 %v2146_v51, %v1244_v49  ;;  %v2014_v51 = vpack.c.bf16 %v1578_v48, %v1577_v44 }
0x16fd   :  { %v1383_v55 = vsel %vm1360_vm3, %v2148_v52, 0.0  ;;  %v1579_v52 = vld [vmem:[#allocation9 + $0x20] sm:$0xff] }
0x16fe   :  { %1394 = vperm.xlu0 %2052, %v1383_v55   ;;  %v1385_v57 = vadd.f32 %v1384_v54, %v1383_v55  ;;  %v1582_v55 = vld [vmem:[#allocation9 + $0x38] sm:$0xff] }
0x1700   :  { %v1399_v58 = vmax.f32 %v1385_v57, 1e-30 }
0x1702   :  { %2149 = vrcp.f32 %v1399_v58  ;;  %v1583_v58 = vld [vmem:[#allocation9 + $0x40] sm:$0xff] }
0x170c   :  { %v2150_v59 = vpop.eup %2149 }
0x170d   :  { %1403 = vperm.xlu1 %2051, %v2150_v59   ;;  %v1584_v59 = vld [vmem:[#allocation9 + $0x48] sm:$0xff] }
0x170e   :  { %v2023_v27 = vpack.c.bf16 %v1584_v59, %v1583_v58 }
0x1726   :  { %v538_v6 = vpop.permute.xlu1 %537 }
0x1727   :  { %v540_v10 = vmul.f32 %v538_v6, %v405_v9  ;;  %v1589_v6 = vld [vmem:[#allocation9 + $0x70] sm:$0xff] }
0x1728   :  { %v544_v7 = vpop.permute.xlu0 %543  ;;  %v1717_v9 = vld [vmem:[%s2766_s9] ss:$0 sm:$0xff]  ;;  %s2243_s9 = scalar_lea.vmem %s1682_s7, 128 }
0x1729   :  { %v546_v11 = vmul.f32 %v544_v7, %v2522_v17  ;;  %p2244_p4 = scmp.ne.s32.totalorder %s1682_s7, %s2243_s9  ;;  %p2249_p6 = scmp.lt.s32.totalorder %s2243_s9, %s2243_s9 }
0x172a   :  { %v680_v15 = vpop.permute.xlu1 %679 }
0x172b   :  { %v547_v12 = vadd.f32 %v546_v11, %v540_v10  ;;  %p2250_p7 = por %p2249_p6, %p2248_p5 }
0x172c   :  { %v686_v16 = vpop.permute.xlu0 %685 }
0x172d   :  { %v682_v18 = vmul.f32 %v680_v15, %v547_v12  ;;  %v688_v33 = vmul.f32 %v686_v16, %v2544_v45  ;;  %p2251_p8 = pnand %p2250_p7, %p2244_p4 }
0x172e   :  { %v822_v22 = vpop.permute.xlu1 %821 }
0x172f   :  { %v689_v21 = vadd.f32 %v688_v33, %v682_v18 }
0x1730   :  { %v828_v23 = vpop.permute.xlu0 %827 }
0x1731   :  { %v824_v24 = vmul.f32 %v822_v22, %v689_v21  ;;  %v830_v25 = vmul.f32 %v828_v23, %v2566_v4 }
0x1732   :  { %v964_v26 = vpop.permute.xlu1 %963 }
0x1733   :  { %v831_v56 = vadd.f32 %v830_v25, %v824_v24 }
0x1734   :  { %v970_v28 = vpop.permute.xlu0 %969 }
0x1735   :  { %v966_v30 = vmul.f32 %v964_v26, %v831_v56  ;;  %v972_v35 = vmul.f32 %v970_v28, %v2588_v32  ;;  %v1576_v32 = vld [vmem:[#allocation9 + $0x8] sm:$0xff] }
0x1736   :  { %v1106_v17 = vpop.permute.xlu1 %1105  ;;  %v2011_v47 = vpack.c.bf16 %v1576_v32, %v1575_v31 }
0x1737   :  { %v973_v34 = vadd.f32 %v972_v35, %v966_v30 }
0x1738   :  { %v1112_v29 = vpop.permute.xlu0 %1111  ;;  %2012 = vmatpush3.bf16.msra.mxu1 %v2011_v47 }
0x1739   :  { %v1108_v36 = vmul.f32 %v1106_v17, %v973_v34  ;;  %v1114_v38 = vmul.f32 %v1112_v29, %v2610_v53  ;;  %2013 = vmatprep.subr.bf16.mxu1 %v2279_v0 }
0x173a   :  { %v1248_v45 = vpop.permute.xlu1 %1247 }
0x173b   :  { %v1115_v39 = vadd.f32 %v1114_v38, %v1108_v36 }
0x173c   :  { %v1254_v20 = vpop.permute.xlu0 %1253  ;;  %2015 = vmatpush3.bf16.msra.mxu1 %v2014_v51 }
0x173d   :  { %v1250_v8 = vmul.f32 %v1248_v45, %v1115_v39  ;;  %v1256_v40 = vmul.f32 %v1254_v20, %v2628_v14  ;;  %v1580_v14 = vld [vmem:[#allocation9 + $0x28] sm:$0xff]  ;;  %2016 = vmatprep.subr.bf16.mxu1 %v2279_v0 }
0x173e   :  { %v2017_v54 = vpack.c.bf16 %v1580_v14, %v1579_v52 }
0x173f   :  { %v1257_v41 = vadd.f32 %v1256_v40, %v1250_v8 }
0x1740   :  { %2018 = vmatpush3.bf16.msra.mxu1 %v2017_v54 }
0x1741   :  { %2019 = vmatprep.subr.bf16.mxu1 %v2279_v0 }
0x177b   :  { %v1389_v13 = vpop.permute.xlu1 %1388 }
0x177c   :  { %v1391_v42 = vmul.f32 %v1389_v13, %v1257_v41 }
0x177d   :  { %v1395_v4 = vpop.permute.xlu0 %1394 }
0x177e   :  { %v1397_v43 = vmul.f32 %v1395_v4, %v2663_v50  ;;  %v1581_v50 = vld [vmem:[#allocation9 + $0x30] sm:$0xff] }
0x177f   :  { %v2020_v57 = vpack.c.bf16 %v1582_v55, %v1581_v50 }
0x1780   :  { %v1398_v46 = vadd.f32 %v1397_v43, %v1391_v42 }
0x1781   :  { %2021 = vmatpush3.bf16.msra.mxu1 %v2020_v57 }
0x1782   :  { %2022 = vmatprep.subr.bf16.mxu1 %v2279_v0 }
0x1785   :  { %2024 = vmatpush3.bf16.msra.mxu1 %v2023_v27 }
0x1786   :  { %2025 = vmatprep.subr.bf16.mxu1 %v2279_v0 }
0x1789   :  { %2027 = vmatpush3.bf16.msra.mxu1 %v2026_v62 }
0x178a   :  { %2028 = vmatprep.subr.bf16.mxu1 %v2279_v0 }
0x178c   :  { %v1404_v49 = vpop.permute.xlu1 %1403 }
0x178d   :  { %v1406_v53 = vmul.f32 %v1404_v49, %v1398_v46  ;;  %2030 = vmatpush3.bf16.msra.mxu1 %v2029_v19 }
0x178e   :  { %2031 = vmatprep.subr.bf16.mxu1 %v2279_v0  ;;  %v1590_v0 = vld [vmem:[#allocation9 + $0x78] sm:$0xff] }
0x178f   :  { %1419 = vrot.lane.b32.xlu0 %v1406_v53, %s2284_s5  ;;  %v2032_v7 = vpack.c.bf16 %v1590_v0, %v1589_v6 }
0x1791   :  { %2033 = vmatpush3.bf16.msra.mxu1 %v2032_v7 }
0x1801   :  { %v1420_v3 = vpop.permute.xlu0 %1419 }
0x1802   :  { %1910 = vmatmul.mubr.msk.f32.vlgmr.msra.gmra.mrb[16].mxu0 %vm259_vm4, %v1420_v3 }
0x1803   :  { %1913 = vmatpush3.msk.msra.mxu0 %vm1499_vm2, %v1494_v37  ;;  %1914 = vmatprep.mubr.msk.f32.mxu0 %vm2280_vm0, %v2281_v1  ;;  %v1721_v1 = vld [vmem:[%s2768_s11] ss:$0 sm:$0xff] }
0x180a   :  { %1915 = vmatmul.mubr.msk.f32.vlgmr.msra.gmra.mrb[16].mxu0 %vm1495_vm5, %v1493_v5 }
0x18dd   :  { %v1569_v10 = vpop.f32.mrb[16].mxu0 }
0x18de   :  { %v2034_v11 = vadd.f32 %v1717_v9, %v1569_v10  ;;  %v1916_v12 = vpop.f32.mrb[17].mxu0 }
0x18e0   :  { %v1574_v15 = vmax.f32 %v2034_v11, 0.0 }
0x18e2   :  { %1950 = vmatmul.mubr.f32.vlgmr.msra.gmra.mrb[8].mxu1 %v1574_v15 }
0x19b5   :  { %v1664_v16 = vpop.f32.mrb[8].mxu1 }
0x19b6   :  { %v1665_v18 = vadd.f32 %v1721_v1, %v1664_v16  ;;  %v1951_v33 = vpop.f32.mrb[9].mxu1 }
0x19b8   :  { %v1722_v21 = vmul.f32 -1.442695, %v1665_v18 }
0x19ba   :  { %2151 = vpow2.f32 %v1722_v21 }
0x19c4   :  { %v2152_v22 = vpop.eup %2151 }
0x19c5   :  { %v1671_v23 = vadd.f32 1.0, %v2152_v22 }
0x19c7   :  { %2153 = vrcp.f32 %v1671_v23 }
0x19d1   :  { %v2154_v24 = vpop.eup %2153 }
0x19d2   :  { %1674 = vst [vmem:[#allocation11] sm:$0xff] %v2154_v24 }
0x19d3   :  { %2254 = shalt.err (!%p2251_p8)
}
0x19d4   :  { %s2255_s10 = scalar_lea.hbm %s2769_s12, 128 }
0x19d5   :  { %p2256_p9 = scmp.ne.s32.totalorder %s2769_s12, %s2255_s10  ;;  %p2259_p10 = scmp.lt.u32.totalorder %s2255_s10, %s2769_s12 }
0x19d7   :  { %p2261_p11 = pnand %p2259_p10, %p2256_p9 }
0x19d9   :  { %2264 = shalt.err (!%p2261_p11)
}
0x19da   :  { %1684 = dma.vmem_to_hbm [thread:$0]  %s1682_s7, 128, %s2769_s12, [#allocation5]  }
0x19db   :  { %2271 = dma.done.wait [#allocation5], 128  }
0x19dc   :  { %2272 = vsyncadd [#allocation5], 4294967168 }
0x19dd   :  { %1688 = vsyncpa [#allocation4], 1 }
0x19de   :  { %1689 = vsyncpa [#allocation7], 1 }
0x19df   :  { %1690 = vsyncpa [#allocation10], 1 }
0x19e0   :  { %1691 = vsyncpa [#allocation5], 1 }

</bundles_post_ra>
